<compile_context>
chip_gen: v7x
topology: tpu7x:2x2x1
jax: 0.10.0
libtpu: 0.0.40
codegen_flags: <defaults>
</compile_context>

<pallas_src>
import jax
import jax.numpy as jnp
from jax.experimental import pallas as pl
from jax.experimental.pallas import tpu as pltpu  # noqa: F401  (TPU backend)

EPS = 1e-5


def _mul_conv_bn_kernel(x_ref, w_ref, s_ref, gamma_ref, beta_ref, o_ref):
    # x_ref:     (Cin, P)    channel-major activations (N == 1)
    # w_ref:     (Cout, Cin) 1x1 conv weight
    # s_ref:     (1, Cin)    per-input-channel scale (x319 broadcast)
    # gamma_ref: (Cout, 1)   BN affine weight
    # beta_ref:  (Cout, 1)   BN affine bias
    # o_ref:     (Cout, P)
    p = x_ref.shape[1]

    # Fold the per-Cin scale into the weight (only (Cout,Cin) elements), then
    # feed bf16 operands to the MXU with f32 accumulation.
    w_scaled = (w_ref[...] * s_ref[...]).astype(jnp.bfloat16)          # (Cout, Cin)
    x_bf16 = x_ref[...].astype(jnp.bfloat16)                           # (Cin, P)
    y = jnp.dot(w_scaled, x_bf16,
                preferred_element_type=jnp.float32)                    # (Cout, P) f32

    # Single-pass BN epilogue: mean, var = E[y^2] - mean^2 (clamped >= 0 for
    # numerical safety), affine folded into per-channel a, b.
    inv_p = 1.0 / p
    mean = jnp.sum(y, axis=1, keepdims=True) * inv_p                   # (Cout, 1)
    var = jnp.sum(y * y, axis=1, keepdims=True) * inv_p - mean * mean  # (Cout, 1)
    var = jnp.maximum(var, 0.0)
    a = gamma_ref[...] * jax.lax.rsqrt(var + EPS)                      # gamma * inv_std
    b = beta_ref[...] - mean * a
    o_ref[...] = y * a + b


def mul_conv2d_batchnorm(x, s, w, gamma, beta):
    """x: (1, Cin, H, W) NCHW; s: (1, Cin, 1, 1); w: (Cout, Cin, 1, 1);
    gamma, beta: (Cout,). Returns (1, Cout, H, W) NCHW, float32."""
    N, Cin, H, W = x.shape
    Cout = w.shape[0]
    P = H * W
    # Scale-fold into the weight is only valid for a single batch row.
    assert N == 1, "kernel folds the per-channel scale into the weight; requires N == 1"
    # TODO(synk): for N > 1 or much larger H*W, tile P with a grid (two-phase
    # BN: accumulate per-channel sum/sumsq with the P axis "arbitrary", then a
    # normalize pass) instead of a single full-array block.

    # Free (metadata-only) reshapes: NCHW with N == 1 is already channel-major.
    x2d = x.reshape(Cin, P).astype(jnp.float32)        # (Cin, P)
    w2d = w.reshape(Cout, Cin).astype(jnp.float32)     # (Cout, Cin)
    s2d = s.reshape(1, Cin).astype(jnp.float32)        # (1, Cin)
    g2d = gamma.reshape(Cout, 1).astype(jnp.float32)   # (Cout, 1)
    b2d = beta.reshape(Cout, 1).astype(jnp.float32)    # (Cout, 1)

    out2d = pl.pallas_call(
        _mul_conv_bn_kernel,
        out_shape=jax.ShapeDtypeStruct((Cout, P), jnp.float32),
        in_specs=[
            pl.BlockSpec((Cin, P), lambda: (0, 0)),
            pl.BlockSpec((Cout, Cin), lambda: (0, 0)),
            pl.BlockSpec((1, Cin), lambda: (0, 0)),
            pl.BlockSpec((Cout, 1), lambda: (0, 0)),
            pl.BlockSpec((Cout, 1), lambda: (0, 0)),
        ],
        out_specs=pl.BlockSpec((Cout, P), lambda: (0, 0)),
        # Working set ~2 MiB: default scoped-VMEM limit is plenty on
        # v5e/v6e/v7x; no vmem_limit_bytes override needed.
    )(x2d, w2d, s2d, g2d, b2d)

    # Free reshape back to NCHW.
    return out2d.reshape(N, Cout, H, W)


def _reference(x, s, w, gamma, beta):
    # Pure-JAX reference of the PyTorch forward (training-mode BatchNorm).
    xs = x * s                                                    # broadcast mul
    y = jax.lax.conv_general_dilated(
        xs.astype(jnp.float32), w.astype(jnp.float32),
        window_strides=(1, 1), padding="VALID",
        dimension_numbers=("NCHW", "OIHW", "NCHW"))
    mean = jnp.mean(y, axis=(0, 2, 3), keepdims=True)
    var = jnp.mean((y - mean) ** 2, axis=(0, 2, 3), keepdims=True)
    g = gamma.reshape(1, -1, 1, 1)
    b = beta.reshape(1, -1, 1, 1)
    return (y - mean) * jax.lax.rsqrt(var + EPS) * g + b


if __name__ == "__main__":
    key = jax.random.PRNGKey(0)
    k1, k2, k3, k4, k5 = jax.random.split(key, 5)

    # Shapes implied by the module: x314 (1,864,14,14), x319 (1,864,1,1),
    # Conv2d(864 -> 144, 1x1, bias=False), BatchNorm2d(144).
    N, Cin, Cout, H, W = 1, 864, 144, 14, 14
    x314 = jax.random.normal(k1, (N, Cin, H, W), dtype=jnp.float32)
    x319 = jax.random.normal(k2, (N, Cin, 1, 1), dtype=jnp.float32)
    conv_w = jax.random.normal(k3, (Cout, Cin, 1, 1), dtype=jnp.float32) * 0.02
    gamma = 1.0 + 0.1 * jax.random.normal(k4, (Cout,), dtype=jnp.float32)
    beta = 0.1 * jax.random.normal(k5, (Cout,), dtype=jnp.float32)

    out = jax.block_until_ready(
        mul_conv2d_batchnorm(x314, x319, conv_w, gamma, beta))

    ref = jax.block_until_ready(_reference(x314, x319, conv_w, gamma, beta))
    assert out.shape == (N, Cout, H, W), out.shape
    # bf16 matmul inputs (f32 accumulation) over an 864-deep contraction,
    # normalized by BN -> relative error ~1e-3..1e-2; check at bf16 tolerance.
    assert jnp.allclose(out, ref, atol=2e-2, rtol=2e-2), float(
        jnp.max(jnp.abs(out - ref)))

    print("KERNEL_OK")
</pallas_src>

<mosaic_0001>
module attributes {stable_mosaic.version = 11 : i64} {
  func.func @_mul_conv_bn_kernel(%arg0: memref<864x196xf32, #tpu.memory_space<vmem>>, %arg1: memref<144x864xf32, #tpu.memory_space<vmem>>, %arg2: memref<1x864xf32, #tpu.memory_space<vmem>>, %arg3: memref<144x1xf32, #tpu.memory_space<vmem>>, %arg4: memref<144x1xf32, #tpu.memory_space<vmem>>, %arg5: memref<144x196xf32, #tpu.memory_space<vmem>>) attributes {dimension_semantics = [], scalar_prefetch = 0 : i64, scratch_operands = 0 : i64, tpu.core_type = #tpu.core_type<tc>} {
    %c0 = arith.constant 0 : index
    %c0_0 = arith.constant 0 : index
    %0 = vector.load %arg1[%c0, %c0_0] : memref<144x864xf32, #tpu.memory_space<vmem>>, vector<144x864xf32>
    %c0_1 = arith.constant 0 : index
    %c0_2 = arith.constant 0 : index
    %1 = vector.load %arg2[%c0_1, %c0_2] : memref<1x864xf32, #tpu.memory_space<vmem>>, vector<1x864xf32>
    %2 = vector.broadcast %1 : vector<1x864xf32> to vector<144x864xf32>
    %3 = arith.mulf %0, %2 : vector<144x864xf32>
    %4 = arith.truncf %3 : vector<144x864xf32> to vector<144x864xbf16>
    %c0_3 = arith.constant 0 : index
    %c0_4 = arith.constant 0 : index
    %5 = vector.load %arg0[%c0_3, %c0_4] : memref<864x196xf32, #tpu.memory_space<vmem>>, vector<864x196xf32>
    %6 = arith.truncf %5 : vector<864x196xf32> to vector<864x196xbf16>
    %cst = arith.constant dense<0.000000e+00> : vector<144x196xf32>
    %7 = tpu.matmul %4, %6, %cst {dimension_numbers = #tpu.dot_dimension_numbers<[1], [0], [0], [1], [0, 0, 1, 1], [], []>} : vector<144x864xbf16>, vector<864x196xbf16>, vector<144x196xf32> -> vector<144x196xf32>
    %cst_5 = arith.constant dense<0.000000e+00> : vector<144xf32>
    %8 = vector.multi_reduction <add>, %7, %cst_5 [1] : vector<144x196xf32> to vector<144xf32>
    %9 = vector.shape_cast %8 : vector<144xf32> to vector<144x1xf32>
    %cst_6 = arith.constant 0.00510204071 : f32
    %10 = vector.broadcast %cst_6 : f32 to vector<144x1xf32>
    %11 = arith.mulf %9, %10 : vector<144x1xf32>
    %12 = arith.mulf %7, %7 : vector<144x196xf32>
    %cst_7 = arith.constant dense<0.000000e+00> : vector<144xf32>
    %13 = vector.multi_reduction <add>, %12, %cst_7 [1] : vector<144x196xf32> to vector<144xf32>
    %14 = vector.shape_cast %13 : vector<144xf32> to vector<144x1xf32>
    %cst_8 = arith.constant 0.00510204071 : f32
    %15 = vector.broadcast %cst_8 : f32 to vector<144x1xf32>
    %16 = arith.mulf %14, %15 : vector<144x1xf32>
    %17 = arith.mulf %11, %11 : vector<144x1xf32>
    %18 = arith.subf %16, %17 : vector<144x1xf32>
    %cst_9 = arith.constant 0.000000e+00 : f32
    %19 = vector.broadcast %cst_9 : f32 to vector<144x1xf32>
    %20 = arith.maximumf %18, %19 : vector<144x1xf32>
    %c0_10 = arith.constant 0 : index
    %c0_11 = arith.constant 0 : index
    %21 = vector.load %arg3[%c0_10, %c0_11] : memref<144x1xf32, #tpu.memory_space<vmem>>, vector<144x1xf32>
    %cst_12 = arith.constant 9.99999974E-6 : f32
    %22 = vector.broadcast %cst_12 : f32 to vector<144x1xf32>
    %23 = arith.addf %20, %22 : vector<144x1xf32>
    %24 = math.rsqrt %23 : vector<144x1xf32>
    %25 = arith.mulf %21, %24 : vector<144x1xf32>
    %c0_13 = arith.constant 0 : index
    %c0_14 = arith.constant 0 : index
    %26 = vector.load %arg4[%c0_13, %c0_14] : memref<144x1xf32, #tpu.memory_space<vmem>>, vector<144x1xf32>
    %27 = arith.mulf %11, %25 : vector<144x1xf32>
    %28 = arith.subf %26, %27 : vector<144x1xf32>
    %29 = vector.broadcast %25 : vector<144x1xf32> to vector<144x196xf32>
    %30 = arith.mulf %7, %29 : vector<144x196xf32>
    %31 = vector.broadcast %28 : vector<144x1xf32> to vector<144x196xf32>
    %32 = arith.addf %30, %31 : vector<144x196xf32>
    %c0_15 = arith.constant 0 : index
    %c0_16 = arith.constant 0 : index
    %33 = vector.load %arg5[%c0_15, %c0_16] : memref<144x196xf32, #tpu.memory_space<vmem>>, vector<144x196xf32>
    tpu.vector_store %arg5[%c0_15, %c0_16], %32 {strides = array<i32>} : memref<144x196xf32, #tpu.memory_space<vmem>>, vector<144x196xf32>,
    return
  }
}

</mosaic_0001>

<bundles_post_ra>
// kernel: tpu_custom_call.1
= control target key start
LH: loop header
LB: loop body
LE: loop exit
PB: predicated region body
PF: predicated region fallthrough
CT: control target
= control target key end

     0   :  { %v2102_v34 = vmov 0   ;;  %s3824_s0 = inlined_call_operand.vmem [shape: f32[864,196], index: 0, kind: input, shape index: {}]   ;;  %s3825_s1 = inlined_call_operand.vmem [shape: f32[144,864], index: 1, kind: input, shape index: {}]   ;;  %s3826_s2 = inlined_call_operand.vmem [shape: f32[1,864], index: 2, kind: input, shape index: {}]   ;;  %s3827_s3 = inlined_call_operand.vmem [shape: f32[144,1], index: 3, kind: input, shape index: {}]   ;;  %s3828_s4 = inlined_call_operand.vmem [shape: f32[144,1], index: 4, kind: input, shape index: {}]   ;;  %s3829_s5 = inlined_call_operand.hbm [shape: f32[144,196], index: 5, kind: output, shape index: {}]  }
   0x1   :  { %v375_v0 = vld [vmem:[%s3824_s0 + $0x8] sm:$0xff]  ;;  %v377_v1 = vld [vmem:[%s3824_s0 + $0x18] sm:$0xff]  ;;  %v374_v5 = vld [vmem:[%s3824_s0] sm:$0xff]  ;;  %2041 = vset.pattern.permute.xlu1 %v2102_v34  ;;  %2040 = vset.pattern.permute.xlu0 %v2102_v34 }
   0x2   :  { %v503_v2 = vld [vmem:[%s3824_s0 + $0x408] sm:$0xff]  ;;  %v591_v3 = vpack.c.bf16 %v377_v1, %v375_v0  ;;  %v505_v4 = vld [vmem:[%s3824_s0 + $0x418] sm:$0xff]  ;;  %v376_v6 = vld [vmem:[%s3824_s0 + $0x10] sm:$0xff] }
   0x3   :  { %v655_v7 = vpack.c.bf16 %v505_v4, %v503_v2  ;;  %v590_v8 = vpack.c.bf16 %v376_v6, %v374_v5  ;;  %v502_v9 = vld [vmem:[%s3824_s0 + $0x400] sm:$0xff]  ;;  %v504_v10 = vld [vmem:[%s3824_s0 + $0x410] sm:$0xff]  ;;  %v379_v11 = vld [vmem:[%s3824_s0 + $0x28] sm:$0xff] }
   0x4   :  { %726 = vmatprep.subr.bf16.mxu1 %v591_v3  ;;  %v654_v12 = vpack.c.bf16 %v504_v10, %v502_v9  ;;  %v381_v13 = vld [vmem:[%s3824_s0 + $0x38] sm:$0xff]  ;;  %v507_v14 = vld [vmem:[%s3824_s0 + $0x428] sm:$0xff]  ;;  %v378_v18 = vld [vmem:[%s3824_s0 + $0x20] sm:$0xff] }
   0x5   :  { %v509_v15 = vld [vmem:[%s3824_s0 + $0x438] sm:$0xff]  ;;  %972 = vmatprep.subr.bf16.mxu0 %v655_v7  ;;  %727 = vmatpush1.bf16.msra.mxu1 %v590_v8  ;;  %v593_v16 = vpack.c.bf16 %v381_v13, %v379_v11  ;;  %v380_v19 = vld [vmem:[%s3824_s0 + $0x30] sm:$0xff]  ;;  %v506_v20 = vld [vmem:[%s3824_s0 + $0x420] sm:$0xff] }
   0x6   :  { %v657_v17 = vpack.c.bf16 %v509_v15, %v507_v14  ;;  %973 = vmatpush1.bf16.msra.mxu0 %v654_v12  ;;  %v592_v21 = vpack.c.bf16 %v380_v19, %v378_v18  ;;  %v508_v22 = vld [vmem:[%s3824_s0 + $0x430] sm:$0xff]  ;;  %v383_v23 = vld [vmem:[%s3824_s0 + $0x48] sm:$0xff]  ;;  %v385_v24 = vld [vmem:[%s3824_s0 + $0x58] sm:$0xff] }
   0x7   :  { %728 = vmatprep.subr.bf16.mxu1 %v593_v16  ;;  %v656_v25 = vpack.c.bf16 %v508_v22, %v506_v20  ;;  %v595_v26 = vpack.c.bf16 %v385_v24, %v383_v23  ;;  %v511_v27 = vld [vmem:[%s3824_s0 + $0x448] sm:$0xff]  ;;  %v513_v28 = vld [vmem:[%s3824_s0 + $0x458] sm:$0xff]  ;;  %v382_v29 = vld [vmem:[%s3824_s0 + $0x40] sm:$0xff] }
   0x8   :  { %974 = vmatprep.subr.bf16.mxu0 %v657_v17  ;;  %v659_v30 = vpack.c.bf16 %v513_v28, %v511_v27  ;;  %v384_v31 = vld [vmem:[%s3824_s0 + $0x50] sm:$0xff]  ;;  %v510_v32 = vld [vmem:[%s3824_s0 + $0x440] sm:$0xff]  ;;  %v387_v36 = vld [vmem:[%s3824_s0 + $0x68] sm:$0xff] }
   0x9   :  { %v512_v33 = vld [vmem:[%s3824_s0 + $0x450] sm:$0xff]  ;;  %729 = vmatpush1.bf16.msra.mxu1 %v592_v21  ;;  %v594_v35 = vpack.c.bf16 %v384_v31, %v382_v29  ;;  %v389_v37 = vld [vmem:[%s3824_s0 + $0x78] sm:$0xff]  ;;  %v515_v38 = vld [vmem:[%s3824_s0 + $0x468] sm:$0xff] }
   0xa   :  { %975 = vmatpush1.bf16.msra.mxu0 %v656_v25  ;;  %730 = vmatprep.subr.bf16.mxu1 %v595_v26  ;;  %v658_v39 = vpack.c.bf16 %v512_v33, %v510_v32  ;;  %v597_v40 = vpack.c.bf16 %v389_v37, %v387_v36  ;;  %v517_v41 = vld [vmem:[%s3824_s0 + $0x478] sm:$0xff]  ;;  %v386_v42 = vld [vmem:[%s3824_s0 + $0x60] sm:$0xff]  ;;  %v388_v43 = vld [vmem:[%s3824_s0 + $0x70] sm:$0xff] }
   0xb   :  { %976 = vmatprep.subr.bf16.mxu0 %v659_v30  ;;  %v661_v44 = vpack.c.bf16 %v517_v41, %v515_v38  ;;  %v514_v45 = vld [vmem:[%s3824_s0 + $0x460] sm:$0xff]  ;;  %v516_v46 = vld [vmem:[%s3824_s0 + $0x470] sm:$0xff]  ;;  %v391_v47 = vld [vmem:[%s3824_s0 + $0x88] sm:$0xff]  ;;  %v596_v51 = vpack.c.bf16 %v388_v43, %v386_v42 }
   0xc   :  { %v393_v48 = vld [vmem:[%s3824_s0 + $0x98] sm:$0xff]  ;;  %v519_v49 = vld [vmem:[%s3824_s0 + $0x488] sm:$0xff]  ;;  %v660_v52 = vpack.c.bf16 %v516_v46, %v514_v45  ;;  %v390_v54 = vld [vmem:[%s3824_s0 + $0x80] sm:$0xff] }
   0xd   :  { %v521_v50 = vld [vmem:[%s3824_s0 + $0x498] sm:$0xff]  ;;  %731 = vmatpush1.bf16.msra.mxu1 %v594_v35  ;;  %v599_v53 = vpack.c.bf16 %v393_v48, %v391_v47  ;;  %v392_v55 = vld [vmem:[%s3824_s0 + $0x90] sm:$0xff]  ;;  %v518_v56 = vld [vmem:[%s3824_s0 + $0x480] sm:$0xff] }
   0xe   :  { %977 = vmatpush1.bf16.msra.mxu0 %v658_v39  ;;  %732 = vmatprep.subr.bf16.mxu1 %v597_v40  ;;  %v663_v57 = vpack.c.bf16 %v521_v50, %v519_v49  ;;  %v520_v58 = vld [vmem:[%s3824_s0 + $0x490] sm:$0xff]  ;;  %v395_v59 = vld [vmem:[%s3824_s0 + $0xa8] sm:$0xff]  ;;  %v397_v60 = vld [vmem:[%s3824_s0 + $0xb8] sm:$0xff]  ;;  %v598_v63 = vpack.c.bf16 %v392_v55, %v390_v54  ;;  %v150_v49 = vlaneseq }
   0xf   :  { %978 = vmatprep.subr.bf16.mxu0 %v661_v44  ;;  %v523_v61 = vld [vmem:[%s3824_s0 + $0x4a8] sm:$0xff]  ;;  %v525_v62 = vld [vmem:[%s3824_s0 + $0x4b8] sm:$0xff]  ;;  %v662_v0 = vpack.c.bf16 %v520_v58, %v518_v56  ;;  %v601_v1 = vpack.c.bf16 %v397_v60, %v395_v59  ;;  %v394_v2 = vld [vmem:[%s3824_s0 + $0xa0] sm:$0xff] }
  0x10   :  { %v396_v3 = vld [vmem:[%s3824_s0 + $0xb0] sm:$0xff]  ;;  %v522_v4 = vld [vmem:[%s3824_s0 + $0x4a0] sm:$0xff]  ;;  %v665_v5 = vpack.c.bf16 %v525_v62, %v523_v61  ;;  %v399_v7 = vld [vmem:[%s3824_s0 + $0xc8] sm:$0xff] }
  0x11   :  { %733 = vmatpush1.bf16.msra.mxu1 %v596_v51  ;;  %v524_v6 = vld [vmem:[%s3824_s0 + $0x4b0] sm:$0xff]  ;;  %v401_v8 = vld [vmem:[%s3824_s0 + $0xd8] sm:$0xff]  ;;  %v527_v9 = vld [vmem:[%s3824_s0 + $0x4c8] sm:$0xff]  ;;  %v600_v11 = vpack.c.bf16 %v396_v3, %v394_v2 }
  0x12   :  { %979 = vmatpush1.bf16.msra.mxu0 %v660_v52  ;;  %734 = vmatprep.subr.bf16.mxu1 %v599_v53  ;;  %v529_v10 = vld [vmem:[%s3824_s0 + $0x4d8] sm:$0xff]  ;;  %v664_v12 = vpack.c.bf16 %v524_v6, %v522_v4  ;;  %v603_v13 = vpack.c.bf16 %v401_v8, %v399_v7  ;;  %v398_v14 = vld [vmem:[%s3824_s0 + $0xc0] sm:$0xff]  ;;  %v400_v15 = vld [vmem:[%s3824_s0 + $0xd0] sm:$0xff] }
  0x13   :  { %980 = vmatprep.subr.bf16.mxu0 %v663_v57  ;;  %v526_v16 = vld [vmem:[%s3824_s0 + $0x4c0] sm:$0xff]  ;;  %v667_v17 = vpack.c.bf16 %v529_v10, %v527_v9  ;;  %v528_v18 = vld [vmem:[%s3824_s0 + $0x4d0] sm:$0xff]  ;;  %v403_v19 = vld [vmem:[%s3824_s0 + $0xe8] sm:$0xff]  ;;  %v602_v23 = vpack.c.bf16 %v400_v15, %v398_v14 }
  0x14   :  { %v405_v20 = vld [vmem:[%s3824_s0 + $0xf8] sm:$0xff]  ;;  %v531_v21 = vld [vmem:[%s3824_s0 + $0x4e8] sm:$0xff]  ;;  %v666_v24 = vpack.c.bf16 %v528_v18, %v526_v16  ;;  %v402_v26 = vld [vmem:[%s3824_s0 + $0xe0] sm:$0xff] }
  0x15   :  { %735 = vmatpush1.bf16.msra.mxu1 %v598_v63  ;;  %v533_v22 = vld [vmem:[%s3824_s0 + $0x4f8] sm:$0xff]  ;;  %v605_v25 = vpack.c.bf16 %v405_v20, %v403_v19  ;;  %v404_v27 = vld [vmem:[%s3824_s0 + $0xf0] sm:$0xff]  ;;  %v530_v28 = vld [vmem:[%s3824_s0 + $0x4e0] sm:$0xff]  ;;  %v2393_v63 = vshrl.u32 %v150_v49, 7 }
  0x16   :  { %981 = vmatpush1.bf16.msra.mxu0 %v662_v0  ;;  %736 = vmatprep.subr.bf16.mxu1 %v601_v1  ;;  %v669_v29 = vpack.c.bf16 %v533_v22, %v531_v21  ;;  %v532_v30 = vld [vmem:[%s3824_s0 + $0x4f0] sm:$0xff]  ;;  %v407_v31 = vld [vmem:[%s3824_s0 + $0x108] sm:$0xff]  ;;  %v409_v32 = vld [vmem:[%s3824_s0 + $0x118] sm:$0xff]  ;;  %v604_v36 = vpack.c.bf16 %v404_v27, %v402_v26 }
  0x17   :  { %982 = vmatprep.subr.bf16.mxu0 %v665_v5  ;;  %v535_v33 = vld [vmem:[%s3824_s0 + $0x508] sm:$0xff]  ;;  %v537_v35 = vld [vmem:[%s3824_s0 + $0x518] sm:$0xff]  ;;  %v668_v37 = vpack.c.bf16 %v532_v30, %v530_v28  ;;  %v607_v38 = vpack.c.bf16 %v409_v32, %v407_v31  ;;  %v406_v39 = vld [vmem:[%s3824_s0 + $0x100] sm:$0xff]  ;;  %v156_v16 = vsub.s32 1, %v2393_v63  ;;  %v164_v18 = vsub.s32 3, %v2393_v63 }
  0x18   :  { %v408_v40 = vld [vmem:[%s3824_s0 + $0x110] sm:$0xff]  ;;  %v534_v41 = vld [vmem:[%s3824_s0 + $0x500] sm:$0xff]  ;;  %v671_v42 = vpack.c.bf16 %v537_v35, %v535_v33  ;;  %v411_v44 = vld [vmem:[%s3824_s0 + $0x128] sm:$0xff] }
  0x19   :  { %737 = vmatpush1.bf16.msra.mxu1 %v600_v11  ;;  %v536_v43 = vld [vmem:[%s3824_s0 + $0x510] sm:$0xff]  ;;  %v413_v45 = vld [vmem:[%s3824_s0 + $0x138] sm:$0xff]  ;;  %v539_v46 = vld [vmem:[%s3824_s0 + $0x528] sm:$0xff]  ;;  %v606_v48 = vpack.c.bf16 %v408_v40, %v406_v39 }
  0x1a   :  { %983 = vmatpush1.bf16.msra.mxu0 %v664_v12  ;;  %738 = vmatprep.subr.bf16.mxu1 %v603_v13  ;;  %v541_v47 = vld [vmem:[%s3824_s0 + $0x538] sm:$0xff]  ;;  %v670_v50 = vpack.c.bf16 %v536_v43, %v534_v41  ;;  %v609_v51 = vpack.c.bf16 %v413_v45, %v411_v44  ;;  %v410_v52 = vld [vmem:[%s3824_s0 + $0x120] sm:$0xff]  ;;  %v412_v53 = vld [vmem:[%s3824_s0 + $0x130] sm:$0xff] }
  0x1b   :  { %984 = vmatprep.subr.bf16.mxu0 %v667_v17  ;;  %v538_v54 = vld [vmem:[%s3824_s0 + $0x520] sm:$0xff]  ;;  %v673_v55 = vpack.c.bf16 %v541_v47, %v539_v46  ;;  %v540_v56 = vld [vmem:[%s3824_s0 + $0x530] sm:$0xff]  ;;  %v415_v57 = vld [vmem:[%s3824_s0 + $0x148] sm:$0xff]  ;;  %v608_v61 = vpack.c.bf16 %v412_v53, %v410_v52  ;;  %v172_v17 = vsub.s32 5, %v2393_v63 }
  0x1c   :  { %v417_v58 = vld [vmem:[%s3824_s0 + $0x158] sm:$0xff]  ;;  %v543_v59 = vld [vmem:[%s3824_s0 + $0x548] sm:$0xff]  ;;  %v414_v62 = vld [vmem:[%s3824_s0 + $0x140] sm:$0xff]  ;;  %v672_v0 = vpack.c.bf16 %v540_v56, %v538_v54 }
  0x1d   :  { %739 = vmatpush1.bf16.msra.mxu1 %v602_v23  ;;  %v545_v60 = vld [vmem:[%s3824_s0 + $0x558] sm:$0xff]  ;;  %v611_v1 = vpack.c.bf16 %v417_v58, %v415_v57  ;;  %v416_v2 = vld [vmem:[%s3824_s0 + $0x150] sm:$0xff]  ;;  %v542_v3 = vld [vmem:[%s3824_s0 + $0x540] sm:$0xff] }
  0x1e   :  { %985 = vmatpush1.bf16.msra.mxu0 %v666_v24  ;;  %740 = vmatprep.subr.bf16.mxu1 %v605_v25  ;;  %v544_v4 = vld [vmem:[%s3824_s0 + $0x550] sm:$0xff]  ;;  %v675_v5 = vpack.c.bf16 %v545_v60, %v543_v59  ;;  %v419_v6 = vld [vmem:[%s3824_s0 + $0x168] sm:$0xff]  ;;  %v421_v7 = vld [vmem:[%s3824_s0 + $0x178] sm:$0xff]  ;;  %v610_v12 = vpack.c.bf16 %v416_v2, %v414_v62  ;;  %v160_v24 = vsub.s32 2, %v2393_v63  ;;  %v176_v25 = vsub.s32 6, %v2393_v63 }
  0x1f   :  { %986 = vmatprep.subr.bf16.mxu0 %v669_v29  ;;  %v547_v8 = vld [vmem:[%s3824_s0 + $0x568] sm:$0xff]  ;;  %v549_v9 = vld [vmem:[%s3824_s0 + $0x578] sm:$0xff]  ;;  %v418_v10 = vld [vmem:[%s3824_s0 + $0x160] sm:$0xff]  ;;  %v674_v19 = vpack.c.bf16 %v544_v4, %v542_v3  ;;  %v613_v20 = vpack.c.bf16 %v421_v7, %v419_v6 }
  0x20   :  { %v420_v11 = vld [vmem:[%s3824_s0 + $0x170] sm:$0xff]  ;;  %v546_v13 = vld [vmem:[%s3824_s0 + $0x560] sm:$0xff]  ;;  %v423_v15 = vld [vmem:[%s3824_s0 + $0x188] sm:$0xff]  ;;  %v677_v26 = vpack.c.bf16 %v549_v9, %v547_v8  ;;  %v168_v8 = vsub.s32 4, %v2393_v63 }
  0x21   :  { %741 = vmatpush1.bf16.msra.mxu1 %v604_v36  ;;  %v548_v14 = vld [vmem:[%s3824_s0 + $0x570] sm:$0xff]  ;;  %v425_v21 = vld [vmem:[%s3824_s0 + $0x198] sm:$0xff]  ;;  %v551_v22 = vld [vmem:[%s3824_s0 + $0x588] sm:$0xff]  ;;  %v612_v28 = vpack.c.bf16 %v420_v11, %v418_v10 }
  0x22   :  { %987 = vmatpush1.bf16.msra.mxu0 %v668_v37  ;;  %742 = vmatprep.subr.bf16.mxu1 %v607_v38  ;;  %v553_v23 = vld [vmem:[%s3824_s0 + $0x598] sm:$0xff]  ;;  %v23_v27 = vld [vmem:[%s3825_s1 + $0x8] sm:$0xff]  ;;  %v676_v29 = vpack.c.bf16 %v548_v14, %v546_v13  ;;  %v30_v30 = vld [vmem:[%s3825_s1 + $0x40] sm:$0xff]  ;;  %v615_v33 = vpack.c.bf16 %v425_v21, %v423_v15 }
  0x23   :  { %988 = vmatprep.subr.bf16.mxu0 %v671_v42  ;;  %v2454_v31 = vld [vmem:[%s3826_s2] sm:$0x7f]  ;;  %v27_v32 = vld [vmem:[%s3825_s1 + $0x28] sm:$0xff]  ;;  %v679_v35 = vpack.c.bf16 %v553_v23, %v551_v22  ;;  %v424_v40 = vld [vmem:[%s3824_s0 + $0x190] sm:$0xff] }
  0x24   :  { %v2460_v36 = vrot.slane %v2454_v31, %v156_v16  ;;  %v34_v37 = vld [vmem:[%s3825_s1 + $0x60] sm:$0xff]  ;;  %v2466_v38 = vrot.slane %v2454_v31, %v172_v17  ;;  %v2478_v42 = vrot.slane %v2454_v31, %v164_v18  ;;  %v2481_v43 = vrot.slane %v2454_v31, %v160_v24  ;;  %v552_v45 = vld [vmem:[%s3824_s0 + $0x590] sm:$0xff]  ;;  %v427_v46 = vld [vmem:[%s3824_s0 + $0x1a8] sm:$0xff] }
  0x25   :  { %743 = vmatpush1.bf16.msra.mxu1 %v606_v48  ;;  %v422_v39 = vld [vmem:[%s3824_s0 + $0x180] sm:$0xff]  ;;  %v2484_v44 = vrot.slane %v2454_v31, %v176_v25  ;;  %v429_v47 = vld [vmem:[%s3824_s0 + $0x1b8] sm:$0xff]  ;;  %v555_v52 = vld [vmem:[%s3824_s0 + $0x5a8] sm:$0xff] }
  0x26   :  { %989 = vmatpush1.bf16.msra.mxu0 %v670_v50  ;;  %744 = vmatprep.subr.bf16.mxu1 %v609_v51  ;;  %v550_v41 = vld [vmem:[%s3824_s0 + $0x580] sm:$0xff]  ;;  %v186_v48 = vmul.f32 %v2460_v36, %v23_v27  ;;  %v193_v49 = vmul.f32 %v2460_v36, %v30_v30  ;;  %v190_v50 = vmul.f32 %v2466_v38, %v27_v32  ;;  %v557_v53 = vld [vmem:[%s3824_s0 + $0x5b8] sm:$0xff]  ;;  %v428_v60 = vld [vmem:[%s3824_s0 + $0x1b0] sm:$0xff] }
  0x27   :  { %990 = vmatprep.subr.bf16.mxu0 %v673_v55  ;;  %v197_v51 = vmul.f32 %v2466_v38, %v34_v37  ;;  %v614_v54 = vpack.c.bf16 %v424_v40, %v422_v39  ;;  %v678_v57 = vpack.c.bf16 %v552_v45, %v550_v41  ;;  %v617_v58 = vpack.c.bf16 %v429_v47, %v427_v46  ;;  %v426_v59 = vld [vmem:[%s3824_s0 + $0x1a0] sm:$0xff]  ;;  %v433_v2 = vld [vmem:[%s3824_s0 + $0x1d8] sm:$0xff]  ;;  %v559_v3 = vld [vmem:[%s3824_s0 + $0x5c8] sm:$0xff] }
  0x28   :  { %v312_v55 = vpack.c.bf16 %v193_v49, %v186_v48  ;;  %v681_v62 = vpack.c.bf16 %v557_v53, %v555_v52  ;;  %v561_v4 = vld [vmem:[%s3824_s0 + $0x5d8] sm:$0xff]  ;;  %v616_v6 = vpack.c.bf16 %v428_v60, %v426_v59  ;;  %v430_v7 = vld [vmem:[%s3824_s0 + $0x1c0] sm:$0xff]  ;;  %v432_v11 = vld [vmem:[%s3824_s0 + $0x1d0] sm:$0xff]  ;;  %v2580_v27 = vrot.slane %v2454_v31, %v168_v8 }
  0x29   :  { %745 = vmatpush1.bf16.msra.mxu1 %v608_v61  ;;  %v316_v56 = vpack.c.bf16 %v197_v51, %v190_v50  ;;  %v554_v61 = vld [vmem:[%s3824_s0 + $0x5a0] sm:$0xff]  ;;  %v560_v13 = vld [vmem:[%s3824_s0 + $0x5d0] sm:$0xff]  ;;  %v683_v14 = vpack.c.bf16 %v561_v4, %v559_v3  ;;  %v437_v15 = vld [vmem:[%s3824_s0 + $0x1f8] sm:$0xff]  ;;  %v618_v21 = vpack.c.bf16 %v432_v11, %v430_v7 }
  0x2a   :  { %991 = vmatpush1.bf16.msra.mxu0 %v672_v0  ;;  %746 = vmatprep.subr.bf16.mxu1 %v611_v1  ;;  %v556_v0 = vld [vmem:[%s3824_s0 + $0x5b0] sm:$0xff]  ;;  %v431_v1 = vld [vmem:[%s3824_s0 + $0x1c8] sm:$0xff]  ;;  %v565_v17 = vld [vmem:[%s3824_s0 + $0x5f8] sm:$0xff] }
  0x2b   :  { %992 = vmatprep.subr.bf16.mxu0 %v675_v5  ;;  %758 = vmatprep.mubr.bf16.mxu1 %v312_v55  ;;  %v152_v5 = vsub.s32 0, %v2393_v63  ;;  %v680_v9 = vpack.c.bf16 %v556_v0, %v554_v61  ;;  %v619_v10 = vpack.c.bf16 %v433_v2, %v431_v1  ;;  %v435_v63 = vld [vmem:[%s3824_s0 + $0x1e8] sm:$0xff]  ;;  %v434_v18 = vld [vmem:[%s3824_s0 + $0x1e0] sm:$0xff]  ;;  %v564_v23 = vld [vmem:[%s3824_s0 + $0x5f0] sm:$0xff] }
  0x2c   :  { %1004 = vmatprep.mubr.bf16.mxu0 %v316_v56  ;;  %v563_v16 = vld [vmem:[%s3824_s0 + $0x5e8] sm:$0xff]  ;;  %v562_v22 = vld [vmem:[%s3824_s0 + $0x5e0] sm:$0xff]  ;;  %v29_v25 = vld [vmem:[%s3825_s1 + $0x38] sm:$0xff] }
  0x2d   :  { %747 = vmatpush1.bf16.msra.mxu1 %v610_v12  ;;  %v558_v12 = vld [vmem:[%s3824_s0 + $0x5c0] sm:$0xff]  ;;  %v441_v30 = vld [vmem:[%s3824_s0 + $0x218] sm:$0xff]  ;;  %v44_v45 = vld [vmem:[%s3825_s1 + $0xb0] sm:$0xff] }
  0x2e   :  { %993 = vmatpush1.bf16.msra.mxu0 %v674_v19  ;;  %748 = vmatprep.subr.bf16.mxu1 %v613_v20  ;;  %v436_v19 = vld [vmem:[%s3824_s0 + $0x1f0] sm:$0xff]  ;;  %v2562_v20 = vrot.slane %v2454_v31, %v152_v5  ;;  %v22_v24 = vld [vmem:[%s3825_s1] sm:$0xff]  ;;  %v567_v31 = vld [vmem:[%s3824_s0 + $0x608] sm:$0xff]  ;;  %v207_v0 = vmul.f32 %v2460_v36, %v44_v45 }
  0x2f   :  { %994 = vmatprep.subr.bf16.mxu0 %v677_v26  ;;  %v439_v26 = vld [vmem:[%s3824_s0 + $0x208] sm:$0xff]  ;;  %v26_v32 = vld [vmem:[%s3825_s1 + $0x20] sm:$0xff]  ;;  %v569_v37 = vld [vmem:[%s3824_s0 + $0x618] sm:$0xff]  ;;  %v620_v48 = vpack.c.bf16 %v436_v19, %v434_v18 }
  0x30   :  { %v37_v39 = vld [vmem:[%s3825_s1 + $0x78] sm:$0xff]  ;;  %v185_v40 = vmul.f32 %v2562_v20, %v22_v24  ;;  %v192_v41 = vmul.f32 %v2562_v20, %v29_v25  ;;  %v48_v47 = vld [vmem:[%s3825_s1 + $0xd0] sm:$0xff]  ;;  %v189_v49 = vmul.f32 %v2580_v27, %v26_v32  ;;  %v438_v51 = vld [vmem:[%s3824_s0 + $0x200] sm:$0xff]  ;;  %v623_v55 = vpack.c.bf16 %v441_v30, %v439_v26 }
  0x31   :  { %749 = vmatpush1.bf16.msra.mxu1 %v612_v28  ;;  %v682_v28 = vpack.c.bf16 %v560_v13, %v558_v12  ;;  %v41_v46 = vld [vmem:[%s3825_s1 + $0x98] sm:$0xff]  ;;  %v440_v52 = vld [vmem:[%s3824_s0 + $0x210] sm:$0xff]  ;;  %v566_v53 = vld [vmem:[%s3824_s0 + $0x600] sm:$0xff]  ;;  %v687_v56 = vpack.c.bf16 %v569_v37, %v567_v31  ;;  %v211_v2 = vmul.f32 %v2466_v38, %v48_v47 }
  0x32   :  { %995 = vmatpush1.bf16.msra.mxu0 %v676_v29  ;;  %750 = vmatprep.subr.bf16.mxu1 %v615_v33  ;;  %v621_v29 = vpack.c.bf16 %v437_v15, %v435_v63  ;;  %v33_v33 = vld [vmem:[%s3825_s1 + $0x58] sm:$0xff]  ;;  %v2634_v60 = vld [vmem:[%s3824_s0 + $0x220] sm:$0xff]  ;;  %v2639_v61 = vld [vmem:[%s3824_s0 + $0x230] sm:$0xff]  ;;  %v204_v1 = vmul.f32 %v2466_v38, %v41_v46  ;;  %v311_v4 = vpack.c.bf16 %v192_v41, %v185_v40 }
  0x33   :  { %996 = vmatprep.subr.bf16.mxu0 %v679_v35  ;;  %v685_v35 = vpack.c.bf16 %v565_v17, %v563_v16  ;;  %v196_v50 = vmul.f32 %v2580_v27, %v33_v33  ;;  %v445_v59 = vld [vmem:[%s3824_s0 + $0x238] sm:$0xff]  ;;  %v36_v3 = vld [vmem:[%s3825_s1 + $0x70] sm:$0xff]  ;;  %v43_v5 = vld [vmem:[%s3825_s1 + $0xa8] sm:$0xff] }
  0x34   :  { %v47_v7 = vld [vmem:[%s3825_s1 + $0xc8] sm:$0xff]  ;;  %v573_v12 = vld [vmem:[%s3824_s0 + $0x638] sm:$0xff]  ;;  %v570_v15 = vld [vmem:[%s3824_s0 + $0x620] sm:$0xff]  ;;  %v323_v18 = vpack.c.bf16 %v211_v2, %v204_v1  ;;  %v199_v24 = vmul.f32 %v2562_v20, %v36_v3  ;;  %v206_v25 = vmul.f32 %v2562_v20, %v43_v5 }
  0x35   :  { %751 = vmatpush1.bf16.msra.mxu1 %v614_v54  ;;  %v684_v54 = vpack.c.bf16 %v564_v23, %v562_v22  ;;  %v315_v8 = vpack.c.bf16 %v196_v50, %v189_v49  ;;  %v571_v11 = vld [vmem:[%s3824_s0 + $0x628] sm:$0xff]  ;;  %v449_v63 = vld [vmem:[%s3824_s0 + $0x258] sm:$0xff]  ;;  %v572_v16 = vld [vmem:[%s3824_s0 + $0x630] sm:$0xff]  ;;  %v624_v23 = vpack.c.bf16 %v2639_v61, %v2634_v60  ;;  %v210_v33 = vmul.f32 %v2580_v27, %v47_v7 }
  0x36   :  { %997 = vmatpush1.bf16.msra.mxu0 %v678_v57  ;;  %752 = vmatprep.subr.bf16.mxu1 %v617_v58  ;;  %v568_v57 = vld [vmem:[%s3824_s0 + $0x610] sm:$0xff]  ;;  %v443_v58 = vld [vmem:[%s3824_s0 + $0x228] sm:$0xff]  ;;  %v689_v26 = vpack.c.bf16 %v573_v12, %v571_v11  ;;  %v577_v30 = vld [vmem:[%s3824_s0 + $0x658] sm:$0xff] }
  0x37   :  { %998 = vmatprep.subr.bf16.mxu0 %v681_v62  ;;  %v200_v62 = vmul.f32 %v2460_v36, %v37_v39  ;;  %v686_v13 = vpack.c.bf16 %v568_v57, %v566_v53  ;;  %v51_v19 = vld [vmem:[%s3825_s1 + $0xe8] sm:$0xff]  ;;  %v446_v31 = vld [vmem:[%s3824_s0 + $0x240] sm:$0xff]  ;;  %v448_v37 = vld [vmem:[%s3824_s0 + $0x250] sm:$0xff]  ;;  %v688_v39 = vpack.c.bf16 %v572_v16, %v570_v15 }
  0x38   :  { %v55_v22 = vld [vmem:[%s3825_s1 + $0x108] sm:$0xff]  ;;  %v214_v40 = vmul.f32 %v2460_v36, %v51_v19  ;;  %v453_v46 = vld [vmem:[%s3824_s0 + $0x278] sm:$0xff]  ;;  %v50_v49 = vld [vmem:[%s3825_s1 + $0xe0] sm:$0xff] }
  0x39   :  { %753 = vmatpush1.bf16.msra.mxu1 %v616_v6  ;;  %v40_v6 = vld [vmem:[%s3825_s1 + $0x90] sm:$0xff]  ;;  %v319_v17 = vpack.c.bf16 %v207_v0, %v200_v62  ;;  %v451_v45 = vld [vmem:[%s3824_s0 + $0x268] sm:$0xff]  ;;  %v218_v47 = vmul.f32 %v2466_v38, %v55_v22  ;;  %v581_v61 = vld [vmem:[%s3824_s0 + $0x678] sm:$0xff] }
  0x3a   :  { %999 = vmatpush1.bf16.msra.mxu0 %v680_v9  ;;  %754 = vmatprep.subr.bf16.mxu1 %v619_v10  ;;  %v622_v9 = vpack.c.bf16 %v440_v52, %v438_v51  ;;  %v447_v10 = vld [vmem:[%s3824_s0 + $0x248] sm:$0xff]  ;;  %v203_v32 = vmul.f32 %v2580_v27, %v40_v6  ;;  %v318_v51 = vpack.c.bf16 %v206_v25, %v199_v24  ;;  %v450_v52 = vld [vmem:[%s3824_s0 + $0x260] sm:$0xff]  ;;  %v452_v53 = vld [vmem:[%s3824_s0 + $0x270] sm:$0xff] }
  0x3b   :  { %1000 = vmatprep.subr.bf16.mxu0 %v683_v14  ;;  %v625_v14 = vpack.c.bf16 %v445_v59, %v443_v58  ;;  %v626_v58 = vpack.c.bf16 %v448_v37, %v446_v31  ;;  %v54_v59 = vld [vmem:[%s3825_s1 + $0x100] sm:$0xff]  ;;  %v579_v60 = vld [vmem:[%s3824_s0 + $0x668] sm:$0xff]  ;;  %v629_v62 = vpack.c.bf16 %v453_v46, %v451_v45  ;;  %v61_v1 = vld [vmem:[%s3825_s1 + $0x138] sm:$0xff] }
  0x3c   :  { %v322_v57 = vpack.c.bf16 %v210_v33, %v203_v32  ;;  %v455_v2 = vld [vmem:[%s3824_s0 + $0x288] sm:$0xff]  ;;  %v457_v3 = vld [vmem:[%s3824_s0 + $0x298] sm:$0xff]  ;;  %v72_v6 = vld [vmem:[%s3825_s1 + $0x190] sm:$0xff]  ;;  %v693_v12 = vpack.c.bf16 %v581_v61, %v579_v60  ;;  %v217_v15 = vmul.f32 %v2580_v27, %v54_v59  ;;  %v224_v16 = vmul.f32 %v2580_v27, %v61_v1 }
  0x3d   :  { %755 = vmatpush1.bf16.msra.mxu1 %v618_v21  ;;  %v58_v21 = vld [vmem:[%s3825_s1 + $0x120] sm:$0xff]  ;;  %v65_v5 = vld [vmem:[%s3825_s1 + $0x158] sm:$0xff]  ;;  %v76_v11 = vld [vmem:[%s3825_s1 + $0x1b0] sm:$0xff]  ;;  %v631_v19 = vpack.c.bf16 %v457_v3, %v455_v2  ;;  %v235_v22 = vmul.f32 %v2460_v36, %v72_v6 }
  0x3e   :  { %1001 = vmatpush1.bf16.msra.mxu0 %v682_v28  ;;  %756 = vmatprep.subr.bf16.mxu1 %v621_v29  ;;  %v62_v28 = vld [vmem:[%s3825_s1 + $0x140] sm:$0xff]  ;;  %v575_v29 = vld [vmem:[%s3824_s0 + $0x648] sm:$0xff]  ;;  %v221_v41 = vmul.f32 %v2460_v36, %v58_v21  ;;  %v69_v7 = vld [vmem:[%s3825_s1 + $0x178] sm:$0xff]  ;;  %v228_v21 = vmul.f32 %v2460_v36, %v65_v5 }
  0x3f   :  { %1002 = vmatprep.subr.bf16.mxu0 %v685_v35  ;;  %v627_v35 = vpack.c.bf16 %v449_v63, %v447_v10  ;;  %v691_v50 = vpack.c.bf16 %v577_v30, %v575_v29  ;;  %v628_v63 = vpack.c.bf16 %v452_v53, %v450_v52  ;;  %v461_v24 = vld [vmem:[%s3824_s0 + $0x2b8] sm:$0xff]  ;;  %v64_v25 = vld [vmem:[%s3825_s1 + $0x150] sm:$0xff]  ;;  %v71_v29 = vld [vmem:[%s3825_s1 + $0x188] sm:$0xff] }
  0x40   :  { %v326_v0 = vpack.c.bf16 %v221_v41, %v214_v40  ;;  %v458_v30 = vld [vmem:[%s3824_s0 + $0x2a0] sm:$0xff]  ;;  %v460_v32 = vld [vmem:[%s3824_s0 + $0x2b0] sm:$0xff]  ;;  %v75_v37 = vld [vmem:[%s3825_s1 + $0x1a8] sm:$0xff]  ;;  %v329_v40 = vpack.c.bf16 %v224_v16, %v217_v15 }
  0x41   :  { %757 = vmatpush1.bf16.msra.mxu1 %v620_v48  ;;  %v225_v48 = vmul.f32 %v2466_v38, %v62_v28  ;;  %v239_v28 = vmul.f32 %v2466_v38, %v76_v11  ;;  %v68_v31 = vld [vmem:[%s3825_s1 + $0x170] sm:$0xff]  ;;  %v465_v45 = vld [vmem:[%s3824_s0 + $0x2d8] sm:$0xff]  ;;  %v79_v46 = vld [vmem:[%s3825_s1 + $0x1c8] sm:$0xff]  ;;  %v632_v59 = vpack.c.bf16 %v460_v32, %v458_v30 }
  0x42   :  { %1003 = vmatpush1.bf16.msra.mxu0 %v684_v54  ;;  %849 = vmatprep.subr.bf16.mxu1 %v623_v55  ;;  %v57_v54 = vld [vmem:[%s3825_s1 + $0x118] sm:$0xff]  ;;  %v574_v55 = vld [vmem:[%s3824_s0 + $0x640] sm:$0xff]  ;;  %v583_v52 = vld [vmem:[%s3824_s0 + $0x688] sm:$0xff]  ;;  %v231_v60 = vmul.f32 %v2580_v27, %v68_v31 }
  0x43   :  { %1095 = vmatprep.subr.bf16.mxu0 %v687_v56  ;;  %v576_v56 = vld [vmem:[%s3824_s0 + $0x650] sm:$0xff]  ;;  %v220_v10 = vmul.f32 %v2562_v20, %v57_v54  ;;  %v227_v54 = vmul.f32 %v2562_v20, %v64_v25  ;;  %v462_v2 = vld [vmem:[%s3824_s0 + $0x2c0] sm:$0xff]  ;;  %v469_v11 = vld [vmem:[%s3824_s0 + $0x2f8] sm:$0xff] }
  0x44   :  { %759 = vmatmul.mubr.bf16.vlgmr.msra.gmra.mrb[0].mxu1 %v311_v4  ;;  %v330_v4 = vpack.c.bf16 %v225_v48, %v218_v47  ;;  %v86_v47 = vld [vmem:[%s3825_s1 + $0x200] sm:$0xff]  ;;  %v333_v48 = vpack.c.bf16 %v235_v22, %v228_v21  ;;  %v464_v3 = vld [vmem:[%s3824_s0 + $0x2d0] sm:$0xff]  ;;  %v471_v16 = vld [vmem:[%s3824_s0 + $0x308] sm:$0xff] }
  0x45   :  { %1005 = vmatmul.mubr.bf16.vlgmr.msra.gmra.mrb[0].mxu0 %v315_v8  ;;  %850 = vmatpush1.bf16.msra.mxu1 %v622_v9  ;;  %v690_v8 = vpack.c.bf16 %v576_v56, %v574_v55  ;;  %v213_v9 = vmul.f32 %v2562_v20, %v50_v49  ;;  %v234_v55 = vmul.f32 %v2562_v20, %v71_v29  ;;  %v585_v56 = vld [vmem:[%s3824_s0 + $0x698] sm:$0xff]  ;;  %v468_v15 = vld [vmem:[%s3824_s0 + $0x2f0] sm:$0xff] }
  0x46   :  { %1096 = vmatpush1.bf16.msra.mxu0 %v686_v13  ;;  %851 = vmatprep.subr.bf16.mxu1 %v625_v14  ;;  %v578_v13 = vld [vmem:[%s3824_s0 + $0x660] sm:$0xff]  ;;  %v580_v14 = vld [vmem:[%s3824_s0 + $0x670] sm:$0xff]  ;;  %v695_v61 = vpack.c.bf16 %v585_v56, %v583_v52  ;;  %v249_v5 = vmul.f32 %v2460_v36, %v86_v47  ;;  %v93_v21 = vld [vmem:[%s3825_s1 + $0x238] sm:$0xff] }
  0x47   :  { %768 = vmatprep.mubr.bf16.mxu1 %v319_v17  ;;  %1014 = vmatprep.mubr.bf16.mxu0 %v323_v18  ;;  %v454_v17 = vld [vmem:[%s3824_s0 + $0x280] sm:$0xff]  ;;  %v456_v18 = vld [vmem:[%s3824_s0 + $0x290] sm:$0xff]  ;;  %v692_v33 = vpack.c.bf16 %v580_v14, %v578_v13  ;;  %v89_v13 = vld [vmem:[%s3825_s1 + $0x218] sm:$0xff]  ;;  %v332_v14 = vpack.c.bf16 %v234_v55, %v227_v54  ;;  %v256_v47 = vmul.f32 %v2460_v36, %v93_v21 }
  0x48   :  { %1097 = vmatprep.subr.bf16.mxu0 %v689_v26  ;;  %v232_v26 = vmul.f32 %v2466_v38, %v69_v7  ;;  %v630_v41 = vpack.c.bf16 %v456_v18, %v454_v17  ;;  %v634_v18 = vpack.c.bf16 %v464_v3, %v462_v2  ;;  %v100_v22 = vld [vmem:[%s3825_s1 + $0x270] sm:$0xff]  ;;  %v97_v25 = vld [vmem:[%s3825_s1 + $0x258] sm:$0xff]  ;;  %v99_v54 = vld [vmem:[%s3825_s1 + $0x268] sm:$0xff] }
  0x49   :  { %852 = vmatpush1.bf16.msra.mxu1 %v624_v23  ;;  %v459_v23 = vld [vmem:[%s3824_s0 + $0x2a8] sm:$0xff]  ;;  %v588_v31 = vld [vmem:[%s3824_s0 + $0x6b0] sm:$0xff] }
  0x4a   :  { %853 = vmatprep.subr.bf16.mxu1 %v627_v35  ;;  %1098 = vmatpush1.bf16.msra.mxu0 %v688_v39  ;;  %v325_v35 = vpack.c.bf16 %v220_v10, %v213_v9  ;;  %v463_v39 = vld [vmem:[%s3824_s0 + $0x2c8] sm:$0xff]  ;;  %v633_v49 = vpack.c.bf16 %v461_v24, %v459_v23  ;;  %v337_v53 = vpack.c.bf16 %v239_v28, %v232_v26  ;;  %v85_v9 = vld [vmem:[%s3825_s1 + $0x1f8] sm:$0xff]  ;;  %v104_v26 = vld [vmem:[%s3825_s1 + $0x290] sm:$0xff] }
  0x4b   :  { %1099 = vmatprep.subr.bf16.mxu0 %v691_v50  ;;  %v83_v50 = vld [vmem:[%s3825_s1 + $0x1e8] sm:$0xff]  ;;  %v635_v1 = vpack.c.bf16 %v465_v45, %v463_v39  ;;  %v248_v30 = vmul.f32 %v2562_v20, %v85_v9  ;;  %v252_v39 = vmul.f32 %v2580_v27, %v89_v13  ;;  %v267_v52 = vmul.f32 %v2466_v38, %v104_v26  ;;  %v96_v56 = vld [vmem:[%s3825_s1 + $0x250] sm:$0xff]  ;;  %v118_v9 = vld [vmem:[%s3825_s1 + $0x300] sm:$0xff] }
  0x4c   :  { %769 = vmatmul.mubr.bf16.gmra.mrb[4].mxu1 %v318_v51  ;;  %v90_v51 = vld [vmem:[%s3825_s1 + $0x220] sm:$0xff]  ;;  %v246_v6 = vmul.f32 %v2466_v38, %v83_v50  ;;  %v467_v10 = vld [vmem:[%s3824_s0 + $0x2e8] sm:$0xff]  ;;  %v263_v50 = vmul.f32 %v2460_v36, %v100_v22  ;;  %v281_v21 = vmul.f32 %v2466_v38, %v118_v9 }
  0x4d   :  { %1015 = vmatmul.mubr.bf16.gmra.mrb[4].mxu0 %v322_v57  ;;  %854 = vmatpush1.bf16.msra.mxu1 %v626_v58  ;;  %v582_v57 = vld [vmem:[%s3824_s0 + $0x680] sm:$0xff]  ;;  %v584_v58 = vld [vmem:[%s3824_s0 + $0x690] sm:$0xff]  ;;  %v253_v7 = vmul.f32 %v2466_v38, %v90_v51  ;;  %v587_v28 = vld [vmem:[%s3824_s0 + $0x6a8] sm:$0xff]  ;;  %v637_v32 = vpack.c.bf16 %v469_v11, %v467_v10  ;;  %v260_v51 = vmul.f32 %v2466_v38, %v97_v25 }
  0x4e   :  { %855 = vmatprep.subr.bf16.mxu1 %v629_v62  ;;  %778 = vmatprep.mubr.bf16.mxu1 %v326_v0  ;;  %v694_v62 = vpack.c.bf16 %v584_v58, %v582_v57  ;;  %v238_v0 = vmul.f32 %v2580_v27, %v75_v37  ;;  %v475_v57 = vld [vmem:[%s3824_s0 + $0x328] sm:$0xff]  ;;  %v477_v58 = vld [vmem:[%s3824_s0 + $0x338] sm:$0xff]  ;;  %v262_v11 = vmul.f32 %v2562_v20, %v99_v54  ;;  %v106_v22 = vld [vmem:[%s3825_s1 + $0x2a0] sm:$0xff] }
  0x4f   :  { %1024 = vmatprep.mubr.bf16.mxu0 %v330_v4  ;;  %1100 = vmatpush1.bf16.msra.mxu0 %v690_v8  ;;  %v242_v4 = vmul.f32 %v2460_v36, %v79_v46  ;;  %v78_v8 = vld [vmem:[%s3825_s1 + $0x1c0] sm:$0xff]  ;;  %v344_v24 = vpack.c.bf16 %v253_v7, %v246_v6  ;;  %v351_v2 = vpack.c.bf16 %v267_v52, %v260_v51  ;;  %v479_v3 = vld [vmem:[%s3824_s0 + $0x348] sm:$0xff] }
  0x50   :  { %1101 = vmatprep.subr.bf16.mxu0 %v693_v12  ;;  %v82_v12 = vld [vmem:[%s3825_s1 + $0x1e0] sm:$0xff]  ;;  %v336_v17 = vpack.c.bf16 %v238_v0, %v231_v60  ;;  %v241_v29 = vmul.f32 %v2562_v20, %v78_v8  ;;  %v476_v0 = vld [vmem:[%s3824_s0 + $0x330] sm:$0xff]  ;;  %v641_v6 = vpack.c.bf16 %v477_v58, %v475_v57  ;;  %v111_v8 = vld [vmem:[%s3825_s1 + $0x2c8] sm:$0xff] }
  0x51   :  { %856 = vmatpush1.bf16.msra.mxu1 %v628_v63  ;;  %v466_v63 = vld [vmem:[%s3824_s0 + $0x2e0] sm:$0xff]  ;;  %v340_v23 = vpack.c.bf16 %v249_v5, %v242_v4  ;;  %v245_v37 = vmul.f32 %v2580_v27, %v82_v12  ;;  %v481_v4 = vld [vmem:[%s3824_s0 + $0x358] sm:$0xff]  ;;  %v107_v5 = vld [vmem:[%s3825_s1 + $0x2a8] sm:$0xff]  ;;  %v259_v12 = vmul.f32 %v2580_v27, %v96_v56 }
  0x52   :  { %857 = vmatprep.subr.bf16.mxu1 %v631_v19  ;;  %v473_v19 = vld [vmem:[%s3824_s0 + $0x318] sm:$0xff]  ;;  %v636_v45 = vpack.c.bf16 %v468_v15, %v466_v63  ;;  %v339_v55 = vpack.c.bf16 %v248_v30, %v241_v29  ;;  %v114_v7 = vld [vmem:[%s3825_s1 + $0x2e0] sm:$0xff]  ;;  %v643_v63 = vpack.c.bf16 %v481_v4, %v479_v3  ;;  %v270_v15 = vmul.f32 %v2460_v36, %v107_v5  ;;  %v483_v26 = vld [vmem:[%s3824_s0 + $0x368] sm:$0xff] }
  0x53   :  { %1102 = vmatpush1.bf16.msra.mxu0 %v692_v33  ;;  %v589_v33 = vld [vmem:[%s3824_s0 + $0x6b8] sm:$0xff]  ;;  %v639_v46 = vpack.c.bf16 %v473_v19, %v471_v16  ;;  %v478_v16 = vld [vmem:[%s3824_s0 + $0x340] sm:$0xff]  ;;  %v274_v19 = vmul.f32 %v2466_v38, %v111_v8  ;;  %v124_v5 = vld [vmem:[%s3825_s1 + $0x330] sm:$0xff] }
  0x54   :  { %779 = vmatmul.mubr.bf16.gmra.mrb[8].mxu1 %v325_v35  ;;  %1103 = vmatprep.subr.bf16.mxu0 %v695_v61  ;;  %v586_v35 = vld [vmem:[%s3824_s0 + $0x6a0] sm:$0xff]  ;;  %v103_v61 = vld [vmem:[%s3825_s1 + $0x288] sm:$0xff] }
  0x55   :  { %1025 = vmatmul.mubr.bf16.gmra.mrb[8].mxu0 %v329_v40  ;;  %858 = vmatpush1.bf16.msra.mxu1 %v630_v41  ;;  %v697_v40 = vpack.c.bf16 %v589_v33, %v587_v28  ;;  %v696_v41 = vpack.c.bf16 %v588_v31, %v586_v35  ;;  %v266_v13 = vmul.f32 %v2580_v27, %v103_v61  ;;  %v110_v25 = vld [vmem:[%s3825_s1 + $0x2c0] sm:$0xff]  ;;  %v485_v28 = vld [vmem:[%s3824_s0 + $0x378] sm:$0xff]  ;;  %v484_v35 = vld [vmem:[%s3824_s0 + $0x370] sm:$0xff] }
  0x56   :  { %788 = vmatprep.mubr.bf16.mxu1 %v333_v48  ;;  %859 = vmatprep.subr.bf16.mxu1 %v633_v49  ;;  %v470_v48 = vld [vmem:[%s3824_s0 + $0x300] sm:$0xff]  ;;  %v472_v49 = vld [vmem:[%s3824_s0 + $0x310] sm:$0xff]  ;;  %v273_v51 = vmul.f32 %v2580_v27, %v110_v25 }
  0x57   :  { %1034 = vmatprep.mubr.bf16.mxu0 %v337_v53  ;;  %1104 = vmatpush1.bf16.msra.mxu0 %v694_v62  ;;  %v92_v53 = vld [vmem:[%s3825_s1 + $0x230] sm:$0xff]  ;;  %v638_v60 = vpack.c.bf16 %v472_v49, %v470_v48  ;;  %v474_v62 = vld [vmem:[%s3824_s0 + $0x320] sm:$0xff]  ;;  %v350_v29 = vpack.c.bf16 %v266_v13, %v259_v12  ;;  %v269_v49 = vmul.f32 %v2562_v20, %v106_v22 }
  0x58   :  { %1105 = vmatprep.subr.bf16.mxu0 %v697_v40  ;;  %v255_v10 = vmul.f32 %v2562_v20, %v92_v53  ;;  %v482_v33 = vld [vmem:[%s3824_s0 + $0x360] sm:$0xff]  ;;  %v121_v40 = vld [vmem:[%s3825_s1 + $0x318] sm:$0xff]  ;;  %v132_v48 = vld [vmem:[%s3825_s1 + $0x370] sm:$0xff] }
  0x59   :  { %860 = vmatpush1.bf16.msra.mxu1 %v632_v59  ;;  %v343_v59 = vpack.c.bf16 %v252_v39, %v245_v37  ;;  %v358_v37 = vpack.c.bf16 %v281_v21, %v274_v19  ;;  %v487_v39 = vld [vmem:[%s3824_s0 + $0x388] sm:$0xff]  ;;  %v644_v53 = vpack.c.bf16 %v484_v35, %v482_v33  ;;  %v284_v54 = vmul.f32 %v2460_v36, %v121_v40  ;;  %v120_v61 = vld [vmem:[%s3825_s1 + $0x310] sm:$0xff]  ;;  %v142_v12 = vld [vmem:[%s3825_s1 + $0x3c0] sm:$0xff] }
  0x5a   :  { %861 = vmatprep.subr.bf16.mxu1 %v635_v1  ;;  %v347_v1 = vpack.c.bf16 %v263_v50, %v256_v47  ;;  %v125_v47 = vld [vmem:[%s3825_s1 + $0x338] sm:$0xff]  ;;  %v295_v58 = vmul.f32 %v2466_v38, %v132_v48 }
  0x5b   :  { %1106 = vmatpush1.bf16.msra.mxu0 %v696_v41  ;;  %v128_v41 = vld [vmem:[%s3825_s1 + $0x350] sm:$0xff]  ;;  %v288_v57 = vmul.f32 %v2466_v38, %v125_v47 }
  0x5c   :  { %789 = vmatmul.mubr.bf16.gmra.mrb[12].mxu1 %v332_v14  ;;  %v640_v14 = vpack.c.bf16 %v476_v0, %v474_v62  ;;  %v127_v0 = vld [vmem:[%s3825_s1 + $0x348] sm:$0xff] }
  0x5d   :  { %1035 = vmatmul.mubr.bf16.gmra.mrb[12].mxu0 %v336_v17  ;;  %862 = vmatpush1.bf16.msra.mxu1 %v634_v18  ;;  %v480_v17 = vld [vmem:[%s3824_s0 + $0x350] sm:$0xff]  ;;  %v277_v18 = vmul.f32 %v2460_v36, %v114_v7  ;;  %v490_v7 = vld [vmem:[%s3824_s0 + $0x3a0] sm:$0xff]  ;;  %v365_v9 = vpack.c.bf16 %v295_v58, %v288_v57 }
  0x5e   :  { %798 = vmatprep.mubr.bf16.mxu1 %v340_v23  ;;  %1044 = vmatprep.mubr.bf16.mxu0 %v344_v24  ;;  %v113_v23 = vld [vmem:[%s3825_s1 + $0x2d8] sm:$0xff]  ;;  %v346_v24 = vpack.c.bf16 %v262_v11, %v255_v10  ;;  %v642_v30 = vpack.c.bf16 %v480_v17, %v478_v16  ;;  %v492_v10 = vld [vmem:[%s3824_s0 + $0x3b0] sm:$0xff]  ;;  %v135_v11 = vld [vmem:[%s3825_s1 + $0x388] sm:$0xff] }
  0x5f   :  { %863 = vmatprep.subr.bf16.mxu1 %v637_v32  ;;  %v117_v32 = vld [vmem:[%s3825_s1 + $0x2f8] sm:$0xff]  ;;  %v354_v31 = vpack.c.bf16 %v277_v18, %v270_v15  ;;  %v276_v50 = vmul.f32 %v2562_v20, %v113_v23 }
  0x60   :  { %v280_v52 = vmul.f32 %v2580_v27, %v117_v32 }
  0x61   :  { %864 = vmatpush1.bf16.msra.mxu1 %v636_v45  ;;  %v645_v45 = vpack.c.bf16 %v485_v28, %v483_v26  ;;  %v353_v62 = vpack.c.bf16 %v276_v50, %v269_v49 }
  0x62   :  { %865 = vmatprep.subr.bf16.mxu1 %v639_v46  ;;  %v489_v46 = vld [vmem:[%s3824_s0 + $0x398] sm:$0xff]  ;;  %v357_v3 = vpack.c.bf16 %v280_v52, %v273_v51 }
  0x63   :  { %v647_v56 = vpack.c.bf16 %v489_v46, %v487_v39 }
  0x64   :  { %799 = vmatmul.mubr.bf16.gmra.mrb[16].mxu1 %v339_v55  ;;  %v291_v55 = vmul.f32 %v2460_v36, %v128_v41 }
  0x65   :  { %1045 = vmatmul.mubr.bf16.gmra.mrb[16].mxu0 %v343_v59  ;;  %866 = vmatpush1.bf16.msra.mxu1 %v638_v60  ;;  %v486_v59 = vld [vmem:[%s3824_s0 + $0x380] sm:$0xff]  ;;  %v488_v60 = vld [vmem:[%s3824_s0 + $0x390] sm:$0xff] }
  0x66   :  { %808 = vmatprep.mubr.bf16.mxu1 %v347_v1  ;;  %1054 = vmatprep.mubr.bf16.mxu0 %v351_v2  ;;  %v491_v1 = vld [vmem:[%s3824_s0 + $0x3a8] sm:$0xff]  ;;  %v493_v2 = vld [vmem:[%s3824_s0 + $0x3b8] sm:$0xff]  ;;  %v361_v4 = vpack.c.bf16 %v291_v55, %v284_v54  ;;  %v646_v8 = vpack.c.bf16 %v488_v60, %v486_v59 }
  0x67   :  { %867 = vmatprep.subr.bf16.mxu1 %v641_v6  ;;  %v131_v6 = vld [vmem:[%s3825_s1 + $0x368] sm:$0xff]  ;;  %v649_v13 = vpack.c.bf16 %v493_v2, %v491_v1 }
  0x69   :  { %868 = vmatpush1.bf16.msra.mxu1 %v640_v14  ;;  %v139_v14 = vld [vmem:[%s3825_s1 + $0x3a8] sm:$0xff] }
  0x6a   :  { %869 = vmatprep.subr.bf16.mxu1 %v643_v63  ;;  %v146_v63 = vld [vmem:[%s3825_s1 + $0x3e0] sm:$0xff] }
  0x6c   :  { %809 = vmatmul.mubr.bf16.gmra.mrb[20].mxu1 %v346_v24 }
  0x6d   :  { %1055 = vmatmul.mubr.bf16.gmra.mrb[20].mxu0 %v350_v29  ;;  %870 = vmatpush1.bf16.msra.mxu1 %v642_v30 }
  0x6e   :  { %818 = vmatprep.mubr.bf16.mxu1 %v354_v31  ;;  %1064 = vmatprep.mubr.bf16.mxu0 %v358_v37 }
  0x6f   :  { %871 = vmatprep.subr.bf16.mxu1 %v645_v45 }
  0x71   :  { %872 = vmatpush1.bf16.msra.mxu1 %v644_v53 }
  0x72   :  { %873 = vmatprep.subr.bf16.mxu1 %v647_v56 }
  0x73   :  { %10 = vsyncpa [#allocation3], 0  ;;  %v283_v15 = vmul.f32 %v2562_v20, %v120_v61  ;;  %v290_v16 = vmul.f32 %v2562_v20, %v127_v0  ;;  %v287_v17 = vmul.f32 %v2580_v27, %v124_v5  ;;  %v495_v18 = vld [vmem:[%s3824_s0 + $0x3c8] sm:$0xff]  ;;  %v497_v19 = vld [vmem:[%s3824_s0 + $0x3d8] sm:$0xff]  ;;  %v294_v21 = vmul.f32 %v2580_v27, %v131_v6 }
  0x74   :  { %819 = vmatmul.mubr.bf16.gmra.mrb[24].mxu1 %v353_v62  ;;  %v298_v22 = vmul.f32 %v2460_v36, %v135_v11  ;;  %v305_v23 = vmul.f32 %v2460_v36, %v142_v12  ;;  %v648_v24 = vpack.c.bf16 %v492_v10, %v490_v7  ;;  %v302_v25 = vmul.f32 %v2466_v38, %v139_v14  ;;  %v494_v29 = vld [vmem:[%s3824_s0 + $0x3c0] sm:$0xff]  ;;  %v496_v30 = vld [vmem:[%s3824_s0 + $0x3d0] sm:$0xff]  ;;  %v499_v36 = vld [vmem:[%s3824_s0 + $0x3e8] sm:$0xff] }
  0x75   :  { %1065 = vmatmul.mubr.bf16.gmra.mrb[24].mxu0 %v357_v3  ;;  %828 = vmatprep.mubr.bf16.mxu1 %v361_v4  ;;  %v309_v26 = vmul.f32 %v2466_v38, %v146_v63  ;;  %v651_v28 = vpack.c.bf16 %v497_v19, %v495_v18  ;;  %v360_v32 = vpack.c.bf16 %v290_v16, %v283_v15  ;;  %v501_v33 = vld [vmem:[%s3824_s0 + $0x3f8] sm:$0xff]  ;;  %v134_v31 = vld [vmem:[%s3825_s1 + $0x380] sm:$0xff]  ;;  %v32_v47 = vld [vmem:[%s3825_s1 + $0x50] sm:$0xff]  ;;  %vm698_vm0 = vcmask 785408  }
  0x76   :  { %874 = vmatpush1.bf16.msra.mxu1 %v646_v8  ;;  %1074 = vmatprep.mubr.bf16.mxu0 %v365_v9  ;;  %v364_v38 = vpack.c.bf16 %v294_v21, %v287_v17  ;;  %v368_v35 = vpack.c.bf16 %v305_v23, %v298_v22  ;;  %v141_v37 = vld [vmem:[%s3825_s1 + $0x3b8] sm:$0xff]  ;;  %v138_v39 = vld [vmem:[%s3825_s1 + $0x3a0] sm:$0xff]  ;;  %v650_v41 = vpack.c.bf16 %v496_v30, %v494_v29  ;;  %v500_v50 = vld [vmem:[%s3824_s0 + $0x3f0] sm:$0xff]  ;;  %vm1218_vm1 = vcmask 556032  }
  0x77   :  { %875 = vmatprep.subr.bf16.mxu1 %v649_v13  ;;  %v372_v40 = vpack.c.bf16 %v309_v26, %v302_v25  ;;  %v145_v45 = vld [vmem:[%s3825_s1 + $0x3d8] sm:$0xff]  ;;  %v653_v48 = vpack.c.bf16 %v501_v33, %v499_v36  ;;  %v498_v49 = vld [vmem:[%s3824_s0 + $0x3e0] sm:$0xff]  ;;  %v297_v51 = vmul.f32 %v2562_v20, %v134_v31  ;;  %v304_v52 = vmul.f32 %v2562_v20, %v141_v37  ;;  %v24_v20 = vld [vmem:[%s3825_s1 + $0x10] sm:$0xff] }
  0x78   :  { %v25_v46 = vld [vmem:[%s3825_s1 + $0x18] sm:$0xff]  ;;  %v301_v53 = vmul.f32 %v2580_v27, %v138_v39  ;;  %v308_v54 = vmul.f32 %v2580_v27, %v145_v45  ;;  %v195_v56 = vmul.f32 %v2478_v42, %v32_v47  ;;  %v652_v57 = vpack.c.bf16 %v500_v50, %v498_v49  ;;  %v31_v61 = vld [vmem:[%s3825_s1 + $0x48] sm:$0xff]  ;;  %v28_v27 = vld [vmem:[%s3825_s1 + $0x30] sm:$0xff] }
  0x79   :  { %v188_v55 = vmul.f32 %v2478_v42, %v25_v46  ;;  %v367_v58 = vpack.c.bf16 %v304_v52, %v297_v51  ;;  %v35_v62 = vld [vmem:[%s3825_s1 + $0x68] sm:$0xff]  ;;  %v46_v1 = vld [vmem:[%s3825_s1 + $0xc0] sm:$0xff]  ;;  %v187_v2 = vmul.f32 %v2481_v43, %v24_v20  ;;  %v194_v3 = vmul.f32 %v2481_v43, %v31_v61  ;;  %v45_v12 = vld [vmem:[%s3825_s1 + $0xb8] sm:$0xff] }
  0x7a   :  { %876 = vmatpush1.bf16.msra.mxu1 %v648_v24  ;;  %v371_v59 = vpack.c.bf16 %v308_v54, %v301_v53  ;;  %v39_v0 = vld [vmem:[%s3825_s1 + $0x88] sm:$0xff]  ;;  %v191_v4 = vmul.f32 %v2484_v44, %v28_v27  ;;  %v198_v5 = vmul.f32 %v2484_v44, %v35_v62  ;;  %v209_v7 = vmul.f32 %v2478_v42, %v46_v1  ;;  %v38_v11 = vld [vmem:[%s3825_s1 + $0x80] sm:$0xff]  ;;  %v49_v14 = vld [vmem:[%s3825_s1 + $0xd8] sm:$0xff] }
  0x7b   :  { %877 = vmatprep.subr.bf16.mxu1 %v651_v28  ;;  %v314_v60 = vpack.c.bf16 %v195_v56, %v188_v55  ;;  %v202_v6 = vmul.f32 %v2478_v42, %v39_v0  ;;  %v313_v8 = vpack.c.bf16 %v194_v3, %v187_v2  ;;  %v42_v13 = vld [vmem:[%s3825_s1 + $0xa0] sm:$0xff]  ;;  %v53_v63 = vld [vmem:[%s3825_s1 + $0xf8] sm:$0xff]  ;;  %v60_v15 = vld [vmem:[%s3825_s1 + $0x130] sm:$0xff]  ;;  %v201_v16 = vmul.f32 %v2481_v43, %v38_v11 }
  0x7c   :  { %829 = vmatmul.mubr.bf16.gmra.mrb[28].mxu1 %v360_v32  ;;  %v317_v9 = vpack.c.bf16 %v198_v5, %v191_v4  ;;  %v208_v17 = vmul.f32 %v2481_v43, %v45_v12  ;;  %v205_v18 = vmul.f32 %v2484_v44, %v42_v13  ;;  %v212_v19 = vmul.f32 %v2484_v44, %v49_v14  ;;  %v52_v26 = vld [vmem:[%s3825_s1 + $0xf0] sm:$0xff]  ;;  %v59_v28 = vld [vmem:[%s3825_s1 + $0x128] sm:$0xff]  ;;  %v74_v36 = vld [vmem:[%s3825_s1 + $0x1a0] sm:$0xff] }
  0x7d   :  { %1075 = vmatmul.mubr.bf16.gmra.mrb[28].mxu0 %v364_v38  ;;  %838 = vmatprep.mubr.bf16.mxu1 %v368_v35  ;;  %v321_v10 = vpack.c.bf16 %v209_v7, %v202_v6  ;;  %v216_v21 = vmul.f32 %v2478_v42, %v53_v63  ;;  %v223_v22 = vmul.f32 %v2478_v42, %v60_v15  ;;  %v56_v29 = vld [vmem:[%s3825_s1 + $0x110] sm:$0xff]  ;;  %v63_v30 = vld [vmem:[%s3825_s1 + $0x148] sm:$0xff]  ;;  %v66_v46 = vld [vmem:[%s3825_s1 + $0x160] sm:$0xff] }
  0x7e   :  { %1084 = vmatprep.mubr.bf16.mxu0 %v372_v40  ;;  %878 = vmatpush1.bf16.msra.mxu1 %v650_v41  ;;  %v320_v23 = vpack.c.bf16 %v208_v17, %v201_v16  ;;  %v324_v24 = vpack.c.bf16 %v212_v19, %v205_v18  ;;  %v67_v32 = vld [vmem:[%s3825_s1 + $0x168] sm:$0xff]  ;;  %v215_v33 = vmul.f32 %v2481_v43, %v52_v26  ;;  %v73_v47 = vld [vmem:[%s3825_s1 + $0x198] sm:$0xff]  ;;  %v88_v51 = vld [vmem:[%s3825_s1 + $0x210] sm:$0xff] }
  0x7f   :  { %879 = vmatprep.subr.bf16.mxu1 %v653_v48  ;;  %v328_v25 = vpack.c.bf16 %v223_v22, %v216_v21  ;;  %v222_v38 = vmul.f32 %v2481_v43, %v59_v28  ;;  %v219_v35 = vmul.f32 %v2484_v44, %v56_v29  ;;  %v226_v31 = vmul.f32 %v2484_v44, %v63_v30  ;;  %v70_v48 = vld [vmem:[%s3825_s1 + $0x180] sm:$0xff]  ;;  %v77_v49 = vld [vmem:[%s3825_s1 + $0x1b8] sm:$0xff]  ;;  %v80_v20 = vld [vmem:[%s3825_s1 + $0x1d0] sm:$0xff] }
  0x80   :  { %v230_v37 = vmul.f32 %v2478_v42, %v67_v32  ;;  %v237_v39 = vmul.f32 %v2478_v42, %v74_v36  ;;  %v81_v50 = vld [vmem:[%s3825_s1 + $0x1d8] sm:$0xff]  ;;  %v229_v52 = vmul.f32 %v2481_v43, %v66_v46  ;;  %v236_v53 = vmul.f32 %v2481_v43, %v73_v47  ;;  %v87_v61 = vld [vmem:[%s3825_s1 + $0x208] sm:$0xff]  ;;  %v84_v27 = vld [vmem:[%s3825_s1 + $0x1f0] sm:$0xff] }
  0x81   :  { %v327_v40 = vpack.c.bf16 %v222_v38, %v215_v33  ;;  %v331_v41 = vpack.c.bf16 %v226_v31, %v219_v35  ;;  %v233_v54 = vmul.f32 %v2484_v44, %v70_v48  ;;  %v240_v55 = vmul.f32 %v2484_v44, %v77_v49  ;;  %v91_v62 = vld [vmem:[%s3825_s1 + $0x228] sm:$0xff]  ;;  %v102_v1 = vld [vmem:[%s3825_s1 + $0x280] sm:$0xff]  ;;  %v101_v12 = vld [vmem:[%s3825_s1 + $0x278] sm:$0xff] }
  0x82   :  { %880 = vmatpush1.bf16.msra.mxu1 %v652_v57  ;;  %v335_v45 = vpack.c.bf16 %v237_v39, %v230_v37  ;;  %v244_v56 = vmul.f32 %v2478_v42, %v81_v50  ;;  %v251_v57 = vmul.f32 %v2478_v42, %v88_v51  ;;  %v95_v0 = vld [vmem:[%s3825_s1 + $0x248] sm:$0xff]  ;;  %v243_v2 = vmul.f32 %v2481_v43, %v80_v20  ;;  %v94_v11 = vld [vmem:[%s3825_s1 + $0x240] sm:$0xff]  ;;  %v105_v14 = vld [vmem:[%s3825_s1 + $0x298] sm:$0xff] }
  0x83   :  { %v250_v3 = vmul.f32 %v2481_v43, %v87_v61  ;;  %v247_v4 = vmul.f32 %v2484_v44, %v84_v27  ;;  %v254_v5 = vmul.f32 %v2484_v44, %v91_v62  ;;  %v258_v6 = vmul.f32 %v2478_v42, %v95_v0  ;;  %v98_v13 = vld [vmem:[%s3825_s1 + $0x260] sm:$0xff]  ;;  %v109_v63 = vld [vmem:[%s3825_s1 + $0x2b8] sm:$0xff]  ;;  %v116_v15 = vld [vmem:[%s3825_s1 + $0x2f0] sm:$0xff] }
  0x84   :  { %839 = vmatmul.mubr.bf16.gmra.mrb[32].mxu1 %v367_v58  ;;  %v334_v58 = vpack.c.bf16 %v236_v53, %v229_v52  ;;  %v265_v7 = vmul.f32 %v2478_v42, %v102_v1  ;;  %v257_v16 = vmul.f32 %v2481_v43, %v94_v11  ;;  %v264_v17 = vmul.f32 %v2481_v43, %v101_v12  ;;  %v108_v26 = vld [vmem:[%s3825_s1 + $0x2b0] sm:$0xff]  ;;  %v115_v28 = vld [vmem:[%s3825_s1 + $0x2e8] sm:$0xff]  ;;  %v130_v36 = vld [vmem:[%s3825_s1 + $0x360] sm:$0xff] }
  0x85   :  { %1085 = vmatmul.mubr.bf16.gmra.mrb[32].mxu0 %v371_v59  ;;  %881 = vmatprep.mubr.bf16.mxu1 %v314_v60  ;;  %v338_v59 = vpack.c.bf16 %v240_v55, %v233_v54  ;;  %v342_v60 = vpack.c.bf16 %v251_v57, %v244_v56  ;;  %v261_v18 = vmul.f32 %v2484_v44, %v98_v13  ;;  %v112_v29 = vld [vmem:[%s3825_s1 + $0x2d0] sm:$0xff]  ;;  %v119_v30 = vld [vmem:[%s3825_s1 + $0x308] sm:$0xff]  ;;  %v122_v46 = vld [vmem:[%s3825_s1 + $0x320] sm:$0xff] }
  0x86   :  { %1127 = vmatprep.mubr.bf16.mxu0 %v2102_v34  ;;  %v268_v19 = vmul.f32 %v2484_v44, %v105_v14  ;;  %v272_v21 = vmul.f32 %v2478_v42, %v109_v63  ;;  %v279_v22 = vmul.f32 %v2478_v42, %v116_v15  ;;  %v123_v32 = vld [vmem:[%s3825_s1 + $0x328] sm:$0xff]  ;;  %v271_v33 = vmul.f32 %v2481_v43, %v108_v26  ;;  %v129_v47 = vld [vmem:[%s3825_s1 + $0x358] sm:$0xff]  ;;  %v126_v48 = vld [vmem:[%s3825_s1 + $0x340] sm:$0xff] }
  0x87   :  { %v278_v38 = vmul.f32 %v2481_v43, %v115_v28  ;;  %v275_v35 = vmul.f32 %v2484_v44, %v112_v29  ;;  %v282_v31 = vmul.f32 %v2484_v44, %v119_v30  ;;  %v286_v37 = vmul.f32 %v2478_v42, %v123_v32  ;;  %v133_v49 = vld [vmem:[%s3825_s1 + $0x378] sm:$0xff]  ;;  %v144_v51 = vld [vmem:[%s3825_s1 + $0x3d0] sm:$0xff]  ;;  %v143_v61 = vld [vmem:[%s3825_s1 + $0x3c8] sm:$0xff] }
  0x88   :  { %v293_v39 = vmul.f32 %v2478_v42, %v130_v36  ;;  %v137_v50 = vld [vmem:[%s3825_s1 + $0x398] sm:$0xff]  ;;  %v285_v52 = vmul.f32 %v2481_v43, %v122_v46  ;;  %v292_v53 = vmul.f32 %v2481_v43, %v129_v47  ;;  %v289_v54 = vmul.f32 %v2484_v44, %v126_v48  ;;  %v136_v20 = vld [vmem:[%s3825_s1 + $0x390] sm:$0xff] }
  0x89   :  { %v296_v55 = vmul.f32 %v2484_v44, %v133_v49  ;;  %v300_v56 = vmul.f32 %v2478_v42, %v137_v50  ;;  %v307_v57 = vmul.f32 %v2478_v42, %v144_v51  ;;  %v140_v27 = vld [vmem:[%s3825_s1 + $0x3b0] sm:$0xff]  ;;  %v147_v42 = vld [vmem:[%s3825_s1 + $0x3e8] sm:$0xff]  ;;  %v299_v62 = vmul.f32 %v2481_v43, %v136_v20 }
  0x8a   :  { %v306_v0 = vmul.f32 %v2481_v43, %v143_v61  ;;  %v303_v1 = vmul.f32 %v2484_v44, %v140_v27 }
  0x8c   :  { %882 = vmatmul.mubr.bf16.vlgmr.msra.gmra.mrb[0].mxu1 %v313_v8  ;;  %v341_v8 = vpack.c.bf16 %v250_v3, %v243_v2  ;;  %v310_v2 = vmul.f32 %v2484_v44, %v147_v42  ;;  %v369_v3 = vpack.c.bf16 %v306_v0, %v299_v62 }
  0x8d   :  { %1919 = vmatmul.mubr.msk.bf16.vlgmr.msra.gmra.mrb[0].mxu0 %vm698_vm0, %v317_v9  ;;  %891 = vmatprep.mubr.bf16.mxu1 %v321_v10  ;;  %v345_v9 = vpack.c.bf16 %v254_v5, %v247_v4  ;;  %v349_v10 = vpack.c.bf16 %v265_v7, %v258_v6 }
  0x8e   :  { %1137 = vmatprep.mubr.bf16.mxu0 %v2102_v34  ;;  %v373_v4 = vpack.c.bf16 %v310_v2, %v303_v1 }
  0x94   :  { %892 = vmatmul.mubr.bf16.gmra.mrb[4].mxu1 %v320_v23  ;;  %v348_v23 = vpack.c.bf16 %v264_v17, %v257_v16 }
  0x95   :  { %1920 = vmatmul.mubr.msk.bf16.gmra.mrb[4].mxu0 %vm698_vm0, %v324_v24  ;;  %901 = vmatprep.mubr.bf16.mxu1 %v328_v25  ;;  %v352_v24 = vpack.c.bf16 %v268_v19, %v261_v18  ;;  %v356_v25 = vpack.c.bf16 %v279_v22, %v272_v21 }
  0x96   :  { %1147 = vmatprep.mubr.bf16.mxu0 %v2102_v34 }
  0x9c   :  { %902 = vmatmul.mubr.bf16.gmra.mrb[8].mxu1 %v327_v40  ;;  %v355_v40 = vpack.c.bf16 %v278_v38, %v271_v33 }
  0x9d   :  { %1921 = vmatmul.mubr.msk.bf16.gmra.mrb[8].mxu0 %vm698_vm0, %v331_v41  ;;  %911 = vmatprep.mubr.bf16.mxu1 %v335_v45  ;;  %v359_v41 = vpack.c.bf16 %v282_v31, %v275_v35  ;;  %v363_v45 = vpack.c.bf16 %v293_v39, %v286_v37 }
  0x9e   :  { %1157 = vmatprep.mubr.bf16.mxu0 %v2102_v34 }
  0xa4   :  { %912 = vmatmul.mubr.bf16.gmra.mrb[12].mxu1 %v334_v58  ;;  %v362_v58 = vpack.c.bf16 %v292_v53, %v285_v52 }
  0xa5   :  { %1922 = vmatmul.mubr.msk.bf16.gmra.mrb[12].mxu0 %vm698_vm0, %v338_v59  ;;  %921 = vmatprep.mubr.bf16.mxu1 %v342_v60  ;;  %v366_v59 = vpack.c.bf16 %v296_v55, %v289_v54  ;;  %v370_v60 = vpack.c.bf16 %v307_v57, %v300_v56 }
  0xa6   :  { %1167 = vmatprep.mubr.bf16.mxu0 %v2102_v34 }
  0xac   :  { %922 = vmatmul.mubr.bf16.gmra.mrb[16].mxu1 %v341_v8 }
  0xad   :  { %1923 = vmatmul.mubr.msk.bf16.gmra.mrb[16].mxu0 %vm698_vm0, %v345_v9  ;;  %931 = vmatprep.mubr.bf16.mxu1 %v349_v10 }
  0xae   :  { %1177 = vmatprep.mubr.bf16.mxu0 %v2102_v34 }
  0xb4   :  { %932 = vmatmul.mubr.bf16.gmra.mrb[20].mxu1 %v348_v23 }
  0xb5   :  { %1924 = vmatmul.mubr.msk.bf16.gmra.mrb[20].mxu0 %vm698_vm0, %v352_v24  ;;  %941 = vmatprep.mubr.bf16.mxu1 %v356_v25 }
  0xb6   :  { %1187 = vmatprep.mubr.bf16.mxu0 %v2102_v34 }
  0xbc   :  { %942 = vmatmul.mubr.bf16.gmra.mrb[24].mxu1 %v355_v40 }
  0xbd   :  { %1925 = vmatmul.mubr.msk.bf16.gmra.mrb[24].mxu0 %vm698_vm0, %v359_v41  ;;  %951 = vmatprep.mubr.bf16.mxu1 %v363_v45 }
  0xbe   :  { %1197 = vmatprep.mubr.bf16.mxu0 %v2102_v34 }
  0xc4   :  { %952 = vmatmul.mubr.bf16.gmra.mrb[28].mxu1 %v362_v58 }
  0xc5   :  { %1926 = vmatmul.mubr.msk.bf16.gmra.mrb[28].mxu0 %vm698_vm0, %v366_v59  ;;  %961 = vmatprep.mubr.bf16.mxu1 %v370_v60 }
  0xc6   :  { %1207 = vmatprep.mubr.bf16.mxu0 %v2102_v34 }
  0xcc   :  { %962 = vmatmul.mubr.bf16.gmra.mrb[32].mxu1 %v369_v3 }
  0xcd   :  { %1927 = vmatmul.mubr.msk.bf16.gmra.mrb[32].mxu0 %vm698_vm0, %v373_v4 }
 0x15f   :  { %v883_v5 = vpop.f32.mrb[0].mxu1 }
 0x160   :  { %v1129_v6 = vpop.f32.mrb[0].mxu0  ;;  %v885_v7 = vpop.f32.mrb[1].mxu1 }
 0x161   :  { %v3349_v8 = vadd.f32 %v1129_v6, %v883_v5  ;;  %v1131_v43 = vpop.f32.mrb[1].mxu0  ;;  %v887_v9 = vpop.f32.mrb[2].mxu1 }
 0x162   :  { %v3351_v10 = vadd.f32 %v1131_v43, %v885_v7  ;;  %v1133_v11 = vpop.f32.mrb[2].mxu0  ;;  %v889_v12 = vpop.f32.mrb[3].mxu1 }
 0x163   :  { %v3353_v44 = vadd.f32 %v1133_v11, %v887_v9  ;;  %v1135_v34 = vpop.f32.mrb[3].mxu0  ;;  %v1309_v31 = vmul.f32 %v3349_v8, %v3349_v8 }
 0x164   :  { %v3355_v13 = vadd.f32 %v1135_v34, %v889_v12  ;;  %v1219_v14 = vsel %vm1218_vm1, %v3351_v10, 0.0  ;;  %v1310_v17 = vmul.f32 %v3351_v10, %v3351_v10 }
 0x165   :  { %v1220_v63 = vadd.f32 %v3349_v8, %v1219_v14  ;;  %v1311_v19 = vmul.f32 %v3353_v44, %v3353_v44 }
 0x166   :  { %v1312_v15 = vmul.f32 %v3355_v13, %v3355_v13  ;;  %v1223_v16 = vsel %vm1218_vm1, %v3355_v13, 0.0  ;;  %v1345_v33 = vsel %vm1218_vm1, %v1310_v17, 0.0 }
 0x167   :  { %1221 = vadd.xlane.f32.xlu0 %v1220_v63  ;;  %v893_v18 = vpop.f32.mrb[4].mxu1  ;;  %v1224_v29 = vadd.f32 %v3353_v44, %v1223_v16  ;;  %v1346_v41 = vadd.f32 %v1345_v33, %v1309_v31 }
 0x168   :  { %v1139_v21 = vpop.f32.mrb[4].mxu0  ;;  %v895_v22 = vpop.f32.mrb[5].mxu1  ;;  %v1349_v23 = vsel %vm1218_vm1, %v1312_v15, 0.0 }
 0x169   :  { %v3369_v24 = vadd.f32 %v1139_v21, %v893_v18  ;;  %v1141_v25 = vpop.f32.mrb[5].mxu0  ;;  %v897_v26 = vpop.f32.mrb[6].mxu1  ;;  %v1350_v28 = vadd.f32 %v1349_v23, %v1311_v19 }
 0x16a   :  { %v3372_v30 = vadd.f32 %v1141_v25, %v895_v22  ;;  %v1143_v32 = vpop.f32.mrb[6].mxu0  ;;  %v899_v36 = vpop.f32.mrb[7].mxu1 }
 0x16b   :  { %v3375_v38 = vadd.f32 %v1143_v32, %v897_v26  ;;  %v1145_v35 = vpop.f32.mrb[7].mxu0  ;;  %1351 = vadd.xlane.f32.xlu1 %v1350_v28  ;;  %1225 = vadd.xlane.f32.xlu0 %v1224_v29  ;;  %v1313_v50 = vmul.f32 %v3369_v24, %v3369_v24 }
 0x16c   :  { %v3379_v37 = vadd.f32 %v1145_v35, %v899_v36  ;;  %v1227_v39 = vsel %vm1218_vm1, %v3372_v30, 0.0  ;;  %v1314_v40 = vmul.f32 %v3372_v30, %v3372_v30 }
 0x16d   :  { %v1228_v45 = vadd.f32 %v3369_v24, %v1227_v39  ;;  %v1315_v42 = vmul.f32 %v3375_v38, %v3375_v38 }
 0x16e   :  { %v1353_v46 = vsel %vm1218_vm1, %v1314_v40, 0.0  ;;  %v1231_v47 = vsel %vm1218_vm1, %v3379_v37, 0.0  ;;  %v1316_v48 = vmul.f32 %v3379_v37, %v3379_v37 }
 0x16f   :  { %1347 = vadd.xlane.f32.xlu0 %v1346_v41  ;;  %1229 = vadd.xlane.f32.xlu1 %v1228_v45  ;;  %v903_v49 = vpop.f32.mrb[8].mxu1  ;;  %v1354_v56 = vadd.f32 %v1353_v46, %v1313_v50  ;;  %v1232_v57 = vadd.f32 %v3375_v38, %v1231_v47 }
 0x170   :  { %v1149_v51 = vpop.f32.mrb[8].mxu0  ;;  %v905_v52 = vpop.f32.mrb[9].mxu1  ;;  %v1357_v20 = vsel %vm1218_vm1, %v1316_v48, 0.0 }
 0x171   :  { %v3393_v53 = vadd.f32 %v1149_v51, %v903_v49  ;;  %v1151_v54 = vpop.f32.mrb[9].mxu0  ;;  %v907_v55 = vpop.f32.mrb[10].mxu1  ;;  %v1358_v2 = vadd.f32 %v1357_v20, %v1315_v42 }
 0x172   :  { %v3396_v58 = vadd.f32 %v1151_v54, %v905_v52  ;;  %v1153_v59 = vpop.f32.mrb[10].mxu0  ;;  %v909_v60 = vpop.f32.mrb[11].mxu1 }
 0x173   :  { %v3399_v61 = vadd.f32 %v1153_v59, %v907_v55  ;;  %v1155_v27 = vpop.f32.mrb[11].mxu0  ;;  %1355 = vadd.xlane.f32.xlu0 %v1354_v56  ;;  %1233 = vadd.xlane.f32.xlu1 %v1232_v57  ;;  %v1317_v43 = vmul.f32 %v3393_v53, %v3393_v53 }
 0x174   :  { %v3403_v62 = vadd.f32 %v1155_v27, %v909_v60  ;;  %v1235_v0 = vsel %vm1218_vm1, %v3396_v58, 0.0  ;;  %v1318_v1 = vmul.f32 %v3396_v58, %v3396_v58 }
 0x175   :  { %v1236_v3 = vadd.f32 %v3393_v53, %v1235_v0  ;;  %v1319_v23 = vmul.f32 %v3399_v61, %v3399_v61 }
 0x176   :  { %v1361_v4 = vsel %vm1218_vm1, %v1318_v1, 0.0  ;;  %v1239_v5 = vsel %vm1218_vm1, %v3403_v62, 0.0  ;;  %v1320_v6 = vmul.f32 %v3403_v62, %v3403_v62 }
 0x177   :  { %1359 = vadd.xlane.f32.xlu1 %v1358_v2  ;;  %1237 = vadd.xlane.f32.xlu0 %v1236_v3  ;;  %v913_v7 = vpop.f32.mrb[12].mxu1  ;;  %v1362_v63 = vadd.f32 %v1361_v4, %v1317_v43  ;;  %v1240_v15 = vadd.f32 %v3399_v61, %v1239_v5 }
 0x178   :  { %v1159_v9 = vpop.f32.mrb[12].mxu0  ;;  %v915_v11 = vpop.f32.mrb[13].mxu1  ;;  %v1365_v19 = vsel %vm1218_vm1, %v1320_v6, 0.0 }
 0x179   :  { %v3417_v12 = vadd.f32 %v1159_v9, %v913_v7  ;;  %v1161_v34 = vpop.f32.mrb[13].mxu0  ;;  %v917_v14 = vpop.f32.mrb[14].mxu1  ;;  %v1366_v29 = vadd.f32 %v1365_v19, %v1319_v23 }
 0x17a   :  { %v3420_v16 = vadd.f32 %v1161_v34, %v915_v11  ;;  %v1163_v17 = vpop.f32.mrb[14].mxu0  ;;  %v919_v18 = vpop.f32.mrb[15].mxu1 }
 0x17b   :  { %v3423_v21 = vadd.f32 %v1163_v17, %v917_v14  ;;  %v1165_v22 = vpop.f32.mrb[15].mxu0  ;;  %1363 = vadd.xlane.f32.xlu0 %v1362_v63  ;;  %1241 = vadd.xlane.f32.xlu1 %v1240_v15  ;;  %v1321_v39 = vmul.f32 %v3417_v12, %v3417_v12 }
 0x17c   :  { %v3427_v25 = vadd.f32 %v1165_v22, %v919_v18  ;;  %v1243_v26 = vsel %vm1218_vm1, %v3420_v16, 0.0  ;;  %v1322_v28 = vmul.f32 %v3420_v16, %v3420_v16 }
 0x17d   :  { %v1244_v32 = vadd.f32 %v3417_v12, %v1243_v26  ;;  %v1323_v57 = vmul.f32 %v3423_v21, %v3423_v21 }
 0x17e   :  { %v1369_v36 = vsel %vm1218_vm1, %v1322_v28, 0.0  ;;  %v1247_v33 = vsel %vm1218_vm1, %v3427_v25, 0.0  ;;  %v1324_v35 = vmul.f32 %v3427_v25, %v3427_v25 }
 0x17f   :  { %1367 = vadd.xlane.f32.xlu1 %v1366_v29  ;;  %1245 = vadd.xlane.f32.xlu0 %v1244_v32  ;;  %v923_v31 = vpop.f32.mrb[16].mxu1  ;;  %v1370_v48 = vadd.f32 %v1369_v36, %v1321_v39  ;;  %v1248_v49 = vadd.f32 %v3423_v21, %v1247_v33 }
 0x180   :  { %v1169_v40 = vpop.f32.mrb[16].mxu0  ;;  %v925_v41 = vpop.f32.mrb[17].mxu1  ;;  %v1373_v54 = vsel %vm1218_vm1, %v1324_v35, 0.0 }
 0x181   :  { %v3441_v45 = vadd.f32 %v1169_v40, %v923_v31  ;;  %v1171_v46 = vpop.f32.mrb[17].mxu0  ;;  %v927_v47 = vpop.f32.mrb[18].mxu1  ;;  %v1374_v27 = vadd.f32 %v1373_v54, %v1323_v57 }
 0x182   :  { %v3444_v50 = vadd.f32 %v1171_v46, %v925_v41  ;;  %v1173_v51 = vpop.f32.mrb[18].mxu0  ;;  %v929_v52 = vpop.f32.mrb[19].mxu1 }
 0x183   :  { %v3447_v55 = vadd.f32 %v1173_v51, %v927_v47  ;;  %v1175_v56 = vpop.f32.mrb[19].mxu0  ;;  %1371 = vadd.xlane.f32.xlu0 %v1370_v48  ;;  %1249 = vadd.xlane.f32.xlu1 %v1248_v49  ;;  %v1325_v4 = vmul.f32 %v3441_v45, %v3441_v45 }
 0x184   :  { %v3451_v59 = vadd.f32 %v1175_v56, %v929_v52  ;;  %v1251_v60 = vsel %vm1218_vm1, %v3444_v50, 0.0  ;;  %v1326_v20 = vmul.f32 %v3444_v50, %v3444_v50 }
 0x185   :  { %v1252_v42 = vadd.f32 %v3441_v45, %v1251_v60  ;;  %v1327_v22 = vmul.f32 %v3447_v55, %v3447_v55 }
 0x186   :  { %v1377_v0 = vsel %vm1218_vm1, %v1326_v20, 0.0  ;;  %v1255_v1 = vsel %vm1218_vm1, %v3451_v59, 0.0  ;;  %v1328_v2 = vmul.f32 %v3451_v59, %v3451_v59 }
 0x187   :  { %1375 = vadd.xlane.f32.xlu1 %v1374_v27  ;;  %1253 = vadd.xlane.f32.xlu0 %v1252_v42  ;;  %v933_v3 = vpop.f32.mrb[20].mxu1  ;;  %v1378_v11 = vadd.f32 %v1377_v0, %v1325_v4  ;;  %v1256_v34 = vadd.f32 %v3447_v55, %v1255_v1 }
 0x188   :  { %v1179_v5 = vpop.f32.mrb[20].mxu0  ;;  %v935_v6 = vpop.f32.mrb[21].mxu1  ;;  %v1381_v17 = vsel %vm1218_vm1, %v1328_v2, 0.0 }
 0x189   :  { %v3465_v7 = vadd.f32 %v1179_v5, %v933_v3  ;;  %v1181_v43 = vpop.f32.mrb[21].mxu0  ;;  %v937_v9 = vpop.f32.mrb[22].mxu1  ;;  %v1382_v29 = vadd.f32 %v1381_v17, %v1327_v22 }
 0x18a   :  { %v3468_v14 = vadd.f32 %v1181_v43, %v935_v6  ;;  %v1183_v63 = vpop.f32.mrb[22].mxu0  ;;  %v939_v15 = vpop.f32.mrb[23].mxu1 }
 0x18b   :  { %v3471_v18 = vadd.f32 %v1183_v63, %v937_v9  ;;  %v1185_v19 = vpop.f32.mrb[23].mxu0  ;;  %1379 = vadd.xlane.f32.xlu0 %v1378_v11  ;;  %1257 = vadd.xlane.f32.xlu1 %v1256_v34  ;;  %v1329_v39 = vmul.f32 %v3465_v7, %v3465_v7 }
 0x18c   :  { %v3475_v23 = vadd.f32 %v1185_v19, %v939_v15  ;;  %v1259_v26 = vsel %vm1218_vm1, %v3468_v14, 0.0  ;;  %v1330_v28 = vmul.f32 %v3468_v14, %v3468_v14 }
 0x18d   :  { %v1260_v32 = vadd.f32 %v3465_v7, %v1259_v26  ;;  %v1331_v27 = vmul.f32 %v3471_v18, %v3471_v18 }
 0x18e   :  { %v1385_v36 = vsel %vm1218_vm1, %v1330_v28, 0.0  ;;  %v1263_v33 = vsel %vm1218_vm1, %v3475_v23, 0.0  ;;  %v1332_v35 = vmul.f32 %v3475_v23, %v3475_v23 }
 0x18f   :  { %1383 = vadd.xlane.f32.xlu1 %v1382_v29  ;;  %1261 = vadd.xlane.f32.xlu0 %v1260_v32  ;;  %v943_v31 = vpop.f32.mrb[24].mxu1  ;;  %v1386_v49 = vadd.f32 %v1385_v36, %v1329_v39  ;;  %v1264_v51 = vadd.f32 %v3471_v18, %v1263_v33 }
 0x190   :  { %v1189_v40 = vpop.f32.mrb[24].mxu0  ;;  %v945_v41 = vpop.f32.mrb[25].mxu1  ;;  %v1389_v57 = vsel %vm1218_vm1, %v1332_v35, 0.0 }
 0x191   :  { %v3489_v46 = vadd.f32 %v1189_v40, %v943_v31  ;;  %v1191_v47 = vpop.f32.mrb[25].mxu0  ;;  %v947_v48 = vpop.f32.mrb[26].mxu1  ;;  %v1390_v2 = vadd.f32 %v1389_v57, %v1331_v27 }
 0x192   :  { %v3492_v52 = vadd.f32 %v1191_v47, %v945_v41  ;;  %v1193_v54 = vpop.f32.mrb[26].mxu0  ;;  %v949_v56 = vpop.f32.mrb[27].mxu1 }
 0x193   :  { %v3495_v60 = vadd.f32 %v1193_v54, %v947_v48  ;;  %v1195_v20 = vpop.f32.mrb[27].mxu0  ;;  %1387 = vadd.xlane.f32.xlu0 %v1386_v49  ;;  %1265 = vadd.xlane.f32.xlu1 %v1264_v51  ;;  %v1333_v9 = vmul.f32 %v3489_v46, %v3489_v46 }
 0x194   :  { %v3499_v42 = vadd.f32 %v1195_v20, %v949_v56  ;;  %v1267_v0 = vsel %vm1218_vm1, %v3492_v52, 0.0  ;;  %v1334_v1 = vmul.f32 %v3492_v52, %v3492_v52 }
 0x195   :  { %v1268_v3 = vadd.f32 %v3489_v46, %v1267_v0  ;;  %v1335_v35 = vmul.f32 %v3495_v60, %v3495_v60 }
 0x196   :  { %v1393_v4 = vsel %vm1218_vm1, %v1334_v1, 0.0  ;;  %v1271_v5 = vsel %vm1218_vm1, %v3499_v42, 0.0  ;;  %v1336_v6 = vmul.f32 %v3499_v42, %v3499_v42 }
 0x197   :  { %1391 = vadd.xlane.f32.xlu1 %v1390_v2  ;;  %1269 = vadd.xlane.f32.xlu0 %v1268_v3  ;;  %v953_v43 = vpop.f32.mrb[28].mxu1  ;;  %v1394_v19 = vadd.f32 %v1393_v4, %v1333_v9  ;;  %v1272_v22 = vadd.f32 %v3495_v60, %v1271_v5 }
 0x198   :  { %v1199_v11 = vpop.f32.mrb[28].mxu0  ;;  %v955_v34 = vpop.f32.mrb[29].mxu1  ;;  %v1397_v32 = vsel %vm1218_vm1, %v1336_v6, 0.0 }
 0x199   :  { %v3513_v63 = vadd.f32 %v1199_v11, %v953_v43  ;;  %v1201_v15 = vpop.f32.mrb[29].mxu0  ;;  %v957_v17 = vpop.f32.mrb[30].mxu1  ;;  %v1398_v41 = vadd.f32 %v1397_v32, %v1335_v35 }
 0x19a   :  { %v3516_v26 = vadd.f32 %v1201_v15, %v955_v34  ;;  %v1203_v28 = vpop.f32.mrb[30].mxu0  ;;  %v959_v29 = vpop.f32.mrb[31].mxu1 }
 0x19b   :  { %3835 = vst [vmem:[#allocation5_spill] sm:$0xff] %v3513_v63  ;;  %v3519_v36 = vadd.f32 %v1203_v28, %v957_v17  ;;  %v1205_v33 = vpop.f32.mrb[31].mxu0  ;;  %1395 = vadd.xlane.f32.xlu0 %v1394_v19  ;;  %1273 = vadd.xlane.f32.xlu1 %v1272_v22  ;;  %v1337_v56 = vmul.f32 %v3513_v63, %v3513_v63 }
 0x19c   :  { %3836 = vst [vmem:[#allocation6_spill] sm:$0xff] %v3516_v26  ;;  %v3523_v31 = vadd.f32 %v1205_v33, %v959_v29  ;;  %v1275_v39 = vsel %vm1218_vm1, %v3516_v26, 0.0  ;;  %v1338_v40 = vmul.f32 %v3516_v26, %v3516_v26  ;;  %v1570_v26 = vld [vmem:[%s3828_s4 + $0x48] sm:$0xff] }
 0x19d   :  { %v1276_v47 = vadd.f32 %v3513_v63, %v1275_v39  ;;  %v1339_v34 = vmul.f32 %v3519_v36, %v3519_v36 }
 0x19e   :  { %v1401_v48 = vsel %vm1218_vm1, %v1338_v40, 0.0  ;;  %v1279_v49 = vsel %vm1218_vm1, %v3523_v31, 0.0  ;;  %v1340_v51 = vmul.f32 %v3523_v31, %v3523_v31 }
 0x19f   :  { %1399 = vadd.xlane.f32.xlu1 %v1398_v41  ;;  %1277 = vadd.xlane.f32.xlu0 %v1276_v47  ;;  %v963_v54 = vpop.f32.mrb[32].mxu1  ;;  %v1402_v2 = vadd.f32 %v1401_v48, %v1337_v56  ;;  %v1280_v3 = vadd.f32 %v3519_v36, %v1279_v49 }
 0x1a0   :  { %v1209_v57 = vpop.f32.mrb[32].mxu0  ;;  %v965_v20 = vpop.f32.mrb[33].mxu1  ;;  %v1405_v43 = vsel %vm1218_vm1, %v1340_v51, 0.0 }
 0x1a1   :  { %v3537_v27 = vadd.f32 %v1209_v57, %v963_v54  ;;  %v1211_v0 = vpop.f32.mrb[33].mxu0  ;;  %v967_v1 = vpop.f32.mrb[34].mxu1  ;;  %v1406_v22 = vadd.f32 %v1405_v43, %v1339_v34 }
 0x1a2   :  { %v3540_v4 = vadd.f32 %v1211_v0, %v965_v20  ;;  %v1213_v5 = vpop.f32.mrb[34].mxu0  ;;  %v969_v6 = vpop.f32.mrb[35].mxu1 }
 0x1a3   :  { %3837 = vst [vmem:[#allocation7_spill] sm:$0xff] %v3537_v27  ;;  %v3543_v9 = vadd.f32 %v1213_v5, %v967_v1  ;;  %v1215_v11 = vpop.f32.mrb[35].mxu0  ;;  %1403 = vadd.xlane.f32.xlu0 %v1402_v2  ;;  %1281 = vadd.xlane.f32.xlu1 %v1280_v3  ;;  %v1341_v35 = vmul.f32 %v3537_v27, %v3537_v27 }
 0x1a4   :  { %3838 = vst [vmem:[#allocation8_spill] sm:$0xff] %v3540_v4  ;;  %v3547_v15 = vadd.f32 %v1215_v11, %v969_v6  ;;  %v1283_v17 = vsel %vm1218_vm1, %v3540_v4, 0.0  ;;  %v1342_v19 = vmul.f32 %v3540_v4, %v3540_v4 }
 0x1a5   :  { %v1284_v28 = vadd.f32 %v3537_v27, %v1283_v17  ;;  %v1343_v47 = vmul.f32 %v3543_v9, %v3543_v9 }
 0x1a6   :  { %3839 = vst [vmem:[#allocation9_spill] sm:$0xff] %v3547_v15  ;;  %v1409_v29 = vsel %vm1218_vm1, %v1342_v19, 0.0  ;;  %v1287_v32 = vsel %vm1218_vm1, %v3547_v15, 0.0  ;;  %v1344_v33 = vmul.f32 %v3547_v15, %v3547_v15  ;;  %v1572_v15 = vld [vmem:[%s3828_s4 + $0x58] sm:$0xff] }
 0x1a7   :  { %1407 = vadd.xlane.f32.xlu1 %v1406_v22  ;;  %1285 = vadd.xlane.f32.xlu0 %v1284_v28  ;;  %v1410_v39 = vadd.f32 %v1409_v29, %v1341_v35  ;;  %v1288_v40 = vadd.f32 %v3543_v9, %v1287_v32 }
 0x1a8   :  { %v1413_v41 = vsel %vm1218_vm1, %v1344_v33, 0.0 }
 0x1a9   :  { %v1414_v48 = vadd.f32 %v1413_v41, %v1343_v47 }
 0x1ab   :  { %1411 = vadd.xlane.f32.xlu0 %v1410_v39  ;;  %1289 = vadd.xlane.f32.xlu1 %v1288_v40 }
 0x1af   :  { %1415 = vadd.xlane.f32.xlu1 %v1414_v48 }
 0x1f4   :  { %v1222_v49 = vpop.xlane.xlu0 %1221 }
 0x1f5   :  { %v3565_v56 = vmul.f32 0.0051020407, %v1222_v49 }
 0x1f7   :  { %v1435_v3 = vmul.f32 %v3565_v56, %v3565_v56 }
 0x1f8   :  { %v1352_v51 = vpop.xlane.xlu1 %1351  ;;  %v1226_v54 = vpop.xlane.xlu0 %1225 }
 0x1f9   :  { %v1292_v57 = vmul.f32 0.0051020407, %v1226_v54  ;;  %v1418_v20 = vmul.f32 0.0051020407, %v1352_v51 }
 0x1fb   :  { %v1436_v0 = vmul.f32 %v1292_v57, %v1292_v57 }
 0x1fc   :  { %v1348_v1 = vpop.xlane.xlu0 %1347  ;;  %v1230_v2 = vpop.xlane.xlu1 %1229 }
 0x1fd   :  { %v1454_v5 = vsub.f32 %v1418_v20, %v1436_v0  ;;  %v1417_v6 = vmul.f32 0.0051020407, %v1348_v1  ;;  %v3569_v43 = vmul.f32 0.0051020407, %v1230_v2 }
 0x1ff   :  { %v1472_v11 = vmax.f32 %v1454_v5, 0.0  ;;  %v1453_v34 = vsub.f32 %v1417_v6, %v1435_v3  ;;  %v1437_v29 = vmul.f32 %v3569_v43, %v3569_v43 }
 0x200   :  { %v1356_v17 = vpop.xlane.xlu0 %1355  ;;  %v1234_v19 = vpop.xlane.xlu1 %1233 }
 0x201   :  { %v1508_v22 = vadd.f32 1e-05, %v1472_v11  ;;  %v1471_v28 = vmax.f32 %v1453_v34, 0.0  ;;  %v1419_v32 = vmul.f32 0.0051020407, %v1356_v17  ;;  %v1490_v11 = vld [vmem:[%s3827_s3 + $0x8] sm:$0xff] }
 0x202   :  { %v3573_v33 = vmul.f32 0.0051020407, %v1234_v19 }
 0x203   :  { %2042 = vrsqrt.f32 %v1508_v22  ;;  %v1507_v35 = vadd.f32 1e-05, %v1471_v28  ;;  %v1455_v39 = vsub.f32 %v1419_v32, %v1437_v29 }
 0x204   :  { %v1438_v40 = vmul.f32 %v3573_v33, %v3573_v33  ;;  %v1360_v41 = vpop.xlane.xlu1 %1359  ;;  %v1238_v47 = vpop.xlane.xlu0 %1237 }
 0x205   :  { %2044 = vrsqrt.f32 %v1507_v35  ;;  %v1473_v48 = vmax.f32 %v1455_v39, 0.0  ;;  %v1420_v49 = vmul.f32 0.0051020407, %v1360_v41  ;;  %v3577_v51 = vmul.f32 0.0051020407, %v1238_v47  ;;  %v1489_v35 = vld [vmem:[%s3827_s3] sm:$0xff] }
 0x207   :  { %v1509_v54 = vadd.f32 1e-05, %v1473_v48  ;;  %v1456_v20 = vsub.f32 %v1420_v49, %v1438_v40  ;;  %v1439_v3 = vmul.f32 %v3577_v51, %v3577_v51 }
 0x208   :  { %v1364_v0 = vpop.xlane.xlu0 %1363  ;;  %v1242_v1 = vpop.xlane.xlu1 %1241 }
 0x209   :  { %v1474_v2 = vmax.f32 %v1456_v20, 0.0  ;;  %v1421_v5 = vmul.f32 0.0051020407, %v1364_v0  ;;  %v3581_v6 = vmul.f32 0.0051020407, %v1242_v1  ;;  %2046 = vrsqrt.f32 %v1509_v54  ;;  %v1562_v0 = vld [vmem:[%s3828_s4 + $0x8] sm:$0xff] }
 0x20b   :  { %v1510_v34 = vadd.f32 1e-05, %v1474_v2  ;;  %v1457_v17 = vsub.f32 %v1421_v5, %v1439_v3  ;;  %v1440_v29 = vmul.f32 %v3581_v6, %v3581_v6  ;;  %v1561_v5 = vld [vmem:[%s3828_s4] sm:$0xff] }
 0x20c   :  { %v1368_v19 = vpop.xlane.xlu1 %1367  ;;  %v1246_v22 = vpop.xlane.xlu0 %1245 }
 0x20d   :  { %v2043_v28 = vpop.eup %2042  ;;  %2048 = vrsqrt.f32 %v1510_v34  ;;  %v1422_v32 = vmul.f32 0.0051020407, %v1368_v19  ;;  %v1475_v41 = vmax.f32 %v1457_v17, 0.0  ;;  %v3594_v2 = vmul.f32 0.0051020407, %v1246_v22 }
 0x20e   :  { %v1544_v39 = vmul.f32 %v2043_v28, %v1490_v11 }
 0x20f   :  { %v2045_v40 = vpop.eup %2044  ;;  %v1458_v47 = vsub.f32 %v1422_v32, %v1440_v29  ;;  %v1511_v11 = vadd.f32 1e-05, %v1475_v41  ;;  %v1441_v22 = vmul.f32 %v3594_v2, %v3594_v2  ;;  %v1492_v41 = vld [vmem:[%s3827_s3 + $0x18] sm:$0xff] }
 0x210   :  { %v1580_v48 = vmul.f32 %v1544_v39, %v1292_v57  ;;  %v1372_v49 = vpop.xlane.xlu0 %1371  ;;  %v1250_v54 = vpop.xlane.xlu1 %1249  ;;  %1622 = vperm.xlu1 %2041, %v1544_v39   ;;  %v1543_v20 = vmul.f32 %v2045_v40, %v1489_v35 }
 0x211   :  { %v1476_v1 = vmax.f32 %v1458_v47, 0.0  ;;  %v3596_v3 = vmul.f32 0.0051020407, %v1250_v54  ;;  %v1423_v17 = vmul.f32 0.0051020407, %v1372_v49 }
 0x212   :  { %1617 = vperm.xlu0 %2040, %v1543_v20   ;;  %v1579_v57 = vmul.f32 %v1543_v20, %v3565_v56  ;;  %v1598_v29 = vsub.f32 %v1562_v0, %v1580_v48  ;;  %v1491_v56 = vld [vmem:[%s3827_s3 + $0x10] sm:$0xff] }
 0x213   :  { %v1512_v34 = vadd.f32 1e-05, %v1476_v1  ;;  %v2047_v35 = vpop.eup %2046  ;;  %v1442_v39 = vmul.f32 %v3596_v3, %v3596_v3  ;;  %v1459_v48 = vsub.f32 %v1423_v17, %v1441_v22 }
 0x214   :  { %v1376_v19 = vpop.xlane.xlu1 %1375  ;;  %v1254_v28 = vpop.xlane.xlu0 %1253  ;;  %v1597_v32 = vsub.f32 %v1561_v5, %v1579_v57  ;;  %v1545_v0 = vmul.f32 %v2047_v35, %v1491_v56 }
 0x215   :  { %2050 = vrsqrt.f32 %v1512_v34  ;;  %v1424_v40 = vmul.f32 0.0051020407, %v1376_v19  ;;  %v3612_v57 = vmul.f32 0.0051020407, %v1254_v28  ;;  %v1564_v19 = vld [vmem:[%s3828_s4 + $0x18] sm:$0xff] }
 0x216   :  { %1748 = vperm.xlu0 %2040, %v1598_v29   ;;  %1743 = vperm.xlu1 %2041, %v1597_v32   ;;  %2052 = vrsqrt.f32 %v1511_v11  ;;  %v1477_v32 = vmax.f32 %v1459_v48, 0.0  ;;  %v1581_v35 = vmul.f32 %v1545_v0, %v3569_v43 }
 0x217   :  { %v2049_v47 = vpop.eup %2048  ;;  %v1460_v49 = vsub.f32 %v1424_v40, %v1442_v39  ;;  %v1443_v28 = vmul.f32 %v3612_v57, %v3612_v57 }
 0x218   :  { %v1380_v54 = vpop.xlane.xlu0 %1379  ;;  %v1258_v20 = vpop.xlane.xlu1 %1257  ;;  %v1546_v1 = vmul.f32 %v2049_v47, %v1492_v41  ;;  %v1494_v47 = vld [vmem:[%s3827_s3 + $0x28] sm:$0xff]  ;;  %v1513_v43 = vadd.f32 1e-05, %v1477_v32 }
 0x219   :  { %v1478_v5 = vmax.f32 %v1460_v49, 0.0  ;;  %v3614_v34 = vmul.f32 0.0051020407, %v1258_v20  ;;  %v1425_v17 = vmul.f32 0.0051020407, %v1380_v54 }
 0x21a   :  { %1627 = vperm.xlu1 %2041, %v1545_v0   ;;  %v1582_v29 = vmul.f32 %v1546_v1, %v3573_v33  ;;  %v1563_v33 = vld [vmem:[%s3828_s4 + $0x10] sm:$0xff] }
 0x21b   :  { %v1514_v11 = vadd.f32 1e-05, %v1478_v5  ;;  %v1444_v56 = vmul.f32 %v3614_v34, %v3614_v34  ;;  %v1461_v49 = vsub.f32 %v1425_v17, %v1443_v28  ;;  %v1599_v5 = vsub.f32 %v1563_v33, %v1581_v35 }
 0x21c   :  { %v1384_v22 = vpop.xlane.xlu1 %1383  ;;  %v1262_v39 = vpop.xlane.xlu0 %1261  ;;  %v1600_v40 = vsub.f32 %v1564_v19, %v1582_v29  ;;  %v1493_v29 = vld [vmem:[%s3827_s3 + $0x20] sm:$0xff] }
 0x21d   :  { %2054 = vrsqrt.f32 %v1514_v11  ;;  %v1426_v41 = vmul.f32 0.0051020407, %v1384_v22  ;;  %v3634_v4 = vmul.f32 0.0051020407, %v1262_v39  ;;  %v1479_v17 = vmax.f32 %v1461_v49, 0.0 }
 0x21e   :  { %1758 = vperm.xlu0 %2040, %v1600_v40   ;;  %1632 = vperm.xlu1 %2041, %v1546_v1   ;;  %v1566_v1 = vld [vmem:[%s3828_s4 + $0x28] sm:$0xff]  ;;  %2056 = vrsqrt.f32 %v1513_v43 }
 0x21f   :  { %v2051_v48 = vpop.eup %2050  ;;  %v1462_v54 = vsub.f32 %v1426_v41, %v1444_v56  ;;  %v1445_v39 = vmul.f32 %v3634_v4, %v3634_v4  ;;  %v1515_v49 = vadd.f32 1e-05, %v1479_v17  ;;  %v1568_v17 = vld [vmem:[%s3828_s4 + $0x38] sm:$0xff] }
 0x220   :  { %v1388_v20 = vpop.xlane.xlu0 %1387  ;;  %v1266_v0 = vpop.xlane.xlu1 %1265  ;;  %v1548_v19 = vmul.f32 %v2051_v48, %v1494_v47 }
 0x221   :  { %v2053_v11 = vpop.eup %2052  ;;  %v1480_v22 = vmax.f32 %v1462_v54, 0.0  ;;  %v3636_v27 = vmul.f32 0.0051020407, %v1266_v0  ;;  %v1427_v35 = vmul.f32 0.0051020407, %v1388_v20 }
 0x222   :  { %1753 = vperm.xlu1 %2041, %v1599_v5   ;;  %v1584_v32 = vmul.f32 %v1548_v19, %v3581_v6  ;;  %v1547_v33 = vmul.f32 %v2053_v11, %v1493_v29  ;;  %v1496_v6 = vld [vmem:[%s3827_s3 + $0x38] sm:$0xff]  ;;  %v1565_v11 = vld [vmem:[%s3828_s4 + $0x20] sm:$0xff] }
 0x223   :  { %v1516_v40 = vadd.f32 1e-05, %v1480_v22  ;;  %v1446_v47 = vmul.f32 %v3636_v27, %v3636_v27  ;;  %v1463_v54 = vsub.f32 %v1427_v35, %v1445_v39 }
 0x224   :  { %v1392_v28 = vpop.xlane.xlu1 %1391  ;;  %v1270_v56 = vpop.xlane.xlu0 %1269  ;;  %v1602_v41 = vsub.f32 %v1566_v1, %v1584_v32  ;;  %v1583_v22 = vmul.f32 %v1547_v33, %v3577_v51 }
 0x225   :  { %2058 = vrsqrt.f32 %v1516_v40  ;;  %v1428_v48 = vmul.f32 0.0051020407, %v1392_v28  ;;  %v3653_v32 = vmul.f32 0.0051020407, %v1270_v56  ;;  %v1481_v28 = vmax.f32 %v1463_v54, 0.0 }
 0x226   :  { %1768 = vperm.xlu0 %2040, %v1602_v41   ;;  %1637 = vperm.xlu1 %2041, %v1547_v33   ;;  %2060 = vrsqrt.f32 %v1515_v49  ;;  %v1601_v51 = vsub.f32 %v1565_v11, %v1583_v22 }
 0x227   :  { %v2055_v43 = vpop.eup %2054  ;;  %v1464_v20 = vsub.f32 %v1428_v48, %v1446_v47  ;;  %v1447_v56 = vmul.f32 %v3653_v32, %v3653_v32  ;;  %v1517_v54 = vadd.f32 1e-05, %v1481_v28 }
 0x228   :  { %v1396_v0 = vpop.xlane.xlu0 %1395  ;;  %v1274_v5 = vpop.xlane.xlu1 %1273  ;;  %v1550_v29 = vmul.f32 %v2055_v43, %v1496_v6 }
 0x229   :  { %v1482_v1 = vmax.f32 %v1464_v20, 0.0  ;;  %v3655_v40 = vmul.f32 0.0051020407, %v1274_v5  ;;  %v1429_v39 = vmul.f32 0.0051020407, %v1396_v0  ;;  %v2057_v33 = vpop.eup %2056 }
 0x22a   :  { %1642 = vperm.xlu1 %2041, %v1548_v19   ;;  %v1586_v35 = vmul.f32 %v1550_v29, %v3596_v3  ;;  %v1498_v3 = vld [vmem:[%s3827_s3 + $0x48] sm:$0xff]  ;;  %v1495_v19 = vld [vmem:[%s3827_s3 + $0x30] sm:$0xff] }
 0x22b   :  { %v1518_v41 = vadd.f32 1e-05, %v1482_v1  ;;  %v1448_v43 = vmul.f32 %v3655_v40, %v3655_v40  ;;  %v1465_v0 = vsub.f32 %v1429_v39, %v1447_v56 }
 0x22c   :  { %v1400_v47 = vpop.xlane.xlu1 %1399  ;;  %v1278_v48 = vpop.xlane.xlu0 %1277  ;;  %v1604_v6 = vsub.f32 %v1568_v17, %v1586_v35  ;;  %v1549_v17 = vmul.f32 %v2057_v33, %v1495_v19 }
 0x22d   :  { %2062 = vrsqrt.f32 %v1518_v41  ;;  %v1430_v20 = vmul.f32 0.0051020407, %v1400_v47  ;;  %v3671_v41 = vmul.f32 0.0051020407, %v1278_v48  ;;  %v1483_v28 = vmax.f32 %v1465_v0, 0.0 }
 0x22e   :  { %1778 = vperm.xlu0 %2040, %v1604_v6   ;;  %1763 = vperm.xlu1 %2041, %v1601_v51   ;;  %2064 = vrsqrt.f32 %v1517_v54  ;;  %v1585_v48 = vmul.f32 %v1549_v17, %v3594_v2  ;;  %v1567_v54 = vld [vmem:[%s3828_s4 + $0x30] sm:$0xff] }
 0x22f   :  { %v2059_v49 = vpop.eup %2058  ;;  %v1466_v5 = vsub.f32 %v1430_v20, %v1448_v43  ;;  %v1519_v0 = vadd.f32 1e-05, %v1483_v28 }
 0x230   :  { %v1404_v11 = vpop.xlane.xlu0 %1403  ;;  %v1282_v22 = vpop.xlane.xlu1 %1281  ;;  %v1552_v1 = vmul.f32 %v2059_v49, %v1498_v3  ;;  %v1449_v3 = vmul.f32 %v3671_v41, %v3671_v41 }
 0x231   :  { %v1484_v35 = vmax.f32 %v1466_v5, 0.0  ;;  %v3673_v47 = vmul.f32 0.0051020407, %v1282_v22  ;;  %v1431_v51 = vmul.f32 0.0051020407, %v1404_v11  ;;  %v2061_v20 = vpop.eup %2060 }
 0x232   :  { %1662 = vperm.xlu0 %2040, %v1552_v1   ;;  %1647 = vperm.xlu1 %2041, %v1549_v17   ;;  %v1588_v6 = vmul.f32 %v1552_v1, %v3614_v34  ;;  %v1500_v34 = vld [vmem:[%s3827_s3 + $0x58] sm:$0xff] }
 0x233   :  { %v1520_v39 = vadd.f32 1e-05, %v1484_v35  ;;  %v1450_v19 = vmul.f32 %v3673_v47, %v3673_v47  ;;  %v1467_v5 = vsub.f32 %v1431_v51, %v1449_v3  ;;  %v1603_v35 = vsub.f32 %v1567_v54, %v1585_v48  ;;  %v1569_v54 = vld [vmem:[%s3828_s4 + $0x40] sm:$0xff] }
 0x234   :  { %v1408_v56 = vpop.xlane.xlu1 %1407  ;;  %v1286_v43 = vpop.xlane.xlu0 %1285  ;;  %v1606_v33 = vsub.f32 %v1570_v26, %v1588_v6  ;;  %v1497_v26 = vld [vmem:[%s3827_s3 + $0x40] sm:$0xff] }
 0x235   :  { %2066 = vrsqrt.f32 %v1520_v39  ;;  %v1432_v49 = vmul.f32 0.0051020407, %v1408_v56  ;;  %v1551_v6 = vmul.f32 %v2061_v20, %v1497_v26  ;;  %v3693_v56 = vmul.f32 0.0051020407, %v1286_v43 }
 0x236   :  { %1788 = vperm.xlu0 %2040, %v1606_v33   ;;  %1652 = vperm.xlu1 %2041, %v1550_v29   ;;  %2068 = vrsqrt.f32 %v1519_v0  ;;  %v1485_v28 = vmax.f32 %v1467_v5, 0.0 }
 0x237   :  { %v2063_v2 = vpop.eup %2062  ;;  %v1468_v11 = vsub.f32 %v1432_v49, %v1450_v19  ;;  %v1587_v20 = vmul.f32 %v1551_v6, %v3612_v57  ;;  %v1451_v19 = vmul.f32 %v3693_v56, %v3693_v56 }
 0x238   :  { %v1412_v22 = vpop.xlane.xlu0 %1411  ;;  %v1290_v1 = vpop.xlane.xlu1 %1289  ;;  %v1554_v17 = vmul.f32 %v2063_v2, %v1500_v34  ;;  %v1521_v26 = vadd.f32 1e-05, %v1485_v28 }
 0x239   :  { %v1486_v39 = vmax.f32 %v1468_v11, 0.0  ;;  %v3695_v63 = vmul.f32 0.0051020407, %v1290_v1  ;;  %v1433_v33 = vmul.f32 0.0051020407, %v1412_v22  ;;  %v2065_v43 = vpop.eup %2064  ;;  %v1605_v11 = vsub.f32 %v1569_v54, %v1587_v20 }
 0x23a   :  { %1672 = vperm.xlu0 %2040, %v1554_v17   ;;  %1773 = vperm.xlu1 %2041, %v1603_v35   ;;  %v1590_v29 = vmul.f32 %v1554_v17, %v3636_v27  ;;  %v1502_v27 = vld [vmem:[%s3827_s3 + $0x68] sm:$0xff] }
 0x23b   :  { %v1522_v51 = vadd.f32 1e-05, %v1486_v39  ;;  %v1452_v49 = vmul.f32 %v3695_v63, %v3695_v63  ;;  %v1469_v2 = vsub.f32 %v1433_v33, %v1451_v19  ;;  %v1574_v17 = vld [vmem:[%s3828_s4 + $0x68] sm:$0xff]  ;;  %v1504_v33 = vld [vmem:[%s3827_s3 + $0x78] sm:$0xff] }
 0x23c   :  { %v1416_v3 = vpop.xlane.xlu1 %1415  ;;  %v1608_v48 = vsub.f32 %v1572_v15, %v1590_v29  ;;  %v1499_v15 = vld [vmem:[%s3827_s3 + $0x50] sm:$0xff] }
 0x23d   :  { %2070 = vrsqrt.f32 %v1522_v51  ;;  %v1434_v34 = vmul.f32 0.0051020407, %v1416_v3  ;;  %v1553_v22 = vmul.f32 %v2065_v43, %v1499_v15  ;;  %v1487_v39 = vmax.f32 %v1469_v2, 0.0  ;;  %v1571_v3 = vld [vmem:[%s3828_s4 + $0x50] sm:$0xff] }
 0x23e   :  { %1798 = vperm.xlu0 %2040, %v1608_v48   ;;  %1657 = vperm.xlu1 %2041, %v1551_v6   ;;  %2072 = vrsqrt.f32 %v1521_v26  ;;  %v1506_v26 = vld [vmem:[%s3827_s3 + $0x88] sm:$0xff]  ;;  %v1503_v2 = vld [vmem:[%s3827_s3 + $0x70] sm:$0xff] }
 0x23f   :  { %v2067_v57 = vpop.eup %2066  ;;  %v1470_v0 = vsub.f32 %v1434_v34, %v1452_v49  ;;  %v1589_v28 = vmul.f32 %v1553_v22, %v3634_v4  ;;  %v1523_v20 = vadd.f32 1e-05, %v1487_v39  ;;  %v1576_v49 = vld [vmem:[%s3828_s4 + $0x78] sm:$0xff]  ;;  %v1575_v39 = vld [vmem:[%s3828_s4 + $0x70] sm:$0xff] }
 0x240   :  { %v1556_v5 = vmul.f32 %v2067_v57, %v1502_v27  ;;  %v2069_v51 = vpop.eup %2068  ;;  %v1573_v57 = vld [vmem:[%s3828_s4 + $0x60] sm:$0xff] }
 0x241   :  { %v1488_v1 = vmax.f32 %v1470_v0, 0.0  ;;  %v1607_v4 = vsub.f32 %v1571_v3, %v1589_v28 }
 0x242   :  { %1682 = vperm.xlu0 %2040, %v1556_v5   ;;  %1783 = vperm.xlu1 %2041, %v1605_v11   ;;  %v1592_v35 = vmul.f32 %v1556_v5, %v3655_v40  ;;  %v1501_v40 = vld [vmem:[%s3827_s3 + $0x60] sm:$0xff] }
 0x243   :  { %v1524_v29 = vadd.f32 1e-05, %v1488_v1  ;;  %v1555_v19 = vmul.f32 %v2069_v51, %v1501_v40 }
 0x244   :  { %v1610_v6 = vsub.f32 %v1574_v17, %v1592_v35 }
 0x245   :  { %2074 = vrsqrt.f32 %v1524_v29  ;;  %v1591_v54 = vmul.f32 %v1555_v19, %v3653_v32  ;;  %v1578_v32 = vld [vmem:[%s3828_s4 + $0x88] sm:$0xff]  ;;  %v1505_v29 = vld [vmem:[%s3827_s3 + $0x80] sm:$0xff]  ;;  %s2103_s3 = smov [#allocation2]  }
 0x246   :  { %1808 = vperm.xlu0 %2040, %v1610_v6   ;;  %1667 = vperm.xlu1 %2041, %v1553_v22   ;;  %2076 = vrsqrt.f32 %v1523_v20 }
 0x247   :  { %v2071_v48 = vpop.eup %2070  ;;  %v1609_v0 = vsub.f32 %v1573_v57, %v1591_v54 }
 0x248   :  { %v1558_v43 = vmul.f32 %v2071_v48, %v1504_v33  ;;  %v2073_v15 = vpop.eup %2072 }
 0x249   :  { %v1557_v11 = vmul.f32 %v2073_v15, %v1503_v2 }
 0x24a   :  { %1692 = vperm.xlu0 %2040, %v1558_v43   ;;  %1793 = vperm.xlu1 %2041, %v1607_v4   ;;  %v1594_v34 = vmul.f32 %v1558_v43, %v3673_v47 }
 0x24b   :  { %v1593_v17 = vmul.f32 %v1557_v11, %v3671_v41 }
 0x24c   :  { %v1612_v27 = vsub.f32 %v1576_v49, %v1594_v34 }
 0x24d   :  { %v1611_v6 = vsub.f32 %v1575_v39, %v1593_v17 }
 0x24e   :  { %1818 = vperm.xlu0 %2040, %v1612_v27   ;;  %1677 = vperm.xlu1 %2041, %v1555_v19  }
 0x24f   :  { %v2075_v47 = vpop.eup %2074 }
 0x250   :  { %v1560_v5 = vmul.f32 %v2075_v47, %v1506_v26  ;;  %v2077_v35 = vpop.eup %2076 }
 0x251   :  { %v1559_v28 = vmul.f32 %v2077_v35, %v1505_v29 }
 0x252   :  { %1803 = vperm.xlu1 %2041, %v1609_v0   ;;  %1702 = vperm.xlu0 %2040, %v1560_v5   ;;  %v1596_v22 = vmul.f32 %v1560_v5, %v3695_v63  ;;  %v1577_v63 = vld [vmem:[%s3828_s4 + $0x80] sm:$0xff]  ;;  %s1908_s4 = sshll.u32 %s2103_s3, 4  ;;  %s1909_s4 = int_to_ptr.vmem [resolvable:$true] %s1908_s4 }
 0x253   :  { %v1595_v51 = vmul.f32 %v1559_v28, %v3693_v56  ;;  %s2078_s20 = scalar_lea.vmem %s1909_s4, 4608  ;;  %p2083_p1 = scmp.lt.s32.totalorder %s1909_s4, %s1909_s4 }
 0x254   :  { %v1614_v1 = vsub.f32 %v1578_v32, %v1596_v22  ;;  %p2079_p0 = scmp.ne.s32.totalorder %s1909_s4, %s2078_s20  ;;  %p2084_p2 = scmp.lt.s32.totalorder %s2078_s20, %s2078_s20 }
 0x255   :  { %v1613_v41 = vsub.f32 %v1577_v63, %v1595_v51 }
 0x256   :  { %1687 = vperm.xlu1 %2041, %v1557_v11   ;;  %1828 = vperm.xlu0 %2040, %v1614_v1   ;;  %p2085_p3 = por %p2084_p2, %p2083_p1 }
 0x258   :  { %p2086_p4 = pnand %p2085_p3, %p2079_p0 }
 0x25a   :  { %1813 = vperm.xlu1 %2041, %v1611_v6  }
 0x25e   :  { %1697 = vperm.xlu1 %2041, %v1559_v28  }
 0x262   :  { %1823 = vperm.xlu1 %2041, %v1613_v41  }
 0x28f   :  { %v1623_v33 = vpop.permute.xlu1 %1622 }
 0x290   :  { %v1707_v40 = vmul.f32 %v3353_v44, %v1623_v33  ;;  %v1708_v48 = vmul.f32 %v3355_v13, %v1623_v33 }
 0x291   :  { %v1618_v3 = vpop.permute.xlu0 %1617 }
 0x292   :  { %v1705_v20 = vmul.f32 %v3349_v8, %v1618_v3  ;;  %v1706_v43 = vmul.f32 %v3351_v10, %v1618_v3 }
 0x295   :  { %v1749_v4 = vpop.permute.xlu0 %1748  ;;  %v1744_v19 = vpop.permute.xlu1 %1743 }
 0x296   :  { %v1833_v56 = vadd.f32 %v1749_v4, %v1707_v40  ;;  %v1834_v49 = vadd.f32 %v1749_v4, %v1708_v48  ;;  %v1831_v34 = vadd.f32 %v1744_v19, %v1705_v20  ;;  %v1832_v27 = vadd.f32 %v1744_v19, %v1706_v43 }
 0x298   :  { %1869 = vst [vmem:[#allocation2 + $0x10] sm:$0xff] %v1833_v56  ;;  %1870 = vst.msk [vmem:[#allocation2 + $0x18] sm:$0xff] %vm1218_vm1, %v1834_v49 }
 0x299   :  { %1867 = vst [vmem:[#allocation2] sm:$0xff] %v1831_v34  ;;  %1868 = vst.msk [vmem:[#allocation2 + $0x8] sm:$0xff] %vm1218_vm1, %v1832_v27  ;;  %v1628_v54 = vpop.permute.xlu1 %1627 }
 0x29a   :  { %v1709_v10 = vmul.f32 %v3369_v24, %v1628_v54  ;;  %v1710_v57 = vmul.f32 %v3372_v30, %v1628_v54 }
 0x29d   :  { %v1633_v44 = vpop.permute.xlu1 %1632  ;;  %v1759_v15 = vpop.permute.xlu0 %1758 }
 0x29e   :  { %v1711_v13 = vmul.f32 %v3375_v38, %v1633_v44  ;;  %v1712_v8 = vmul.f32 %v3379_v37, %v1633_v44 }
 0x2a0   :  { %v1837_v26 = vadd.f32 %v1759_v15, %v1711_v13  ;;  %v1838_v2 = vadd.f32 %v1759_v15, %v1712_v8 }
 0x2a1   :  { %v1754_v47 = vpop.permute.xlu1 %1753 }
 0x2a2   :  { %1873 = vst [vmem:[#allocation2 + $0x30] sm:$0xff] %v1837_v26  ;;  %1874 = vst.msk [vmem:[#allocation2 + $0x38] sm:$0xff] %vm1218_vm1, %v1838_v2  ;;  %v1835_v0 = vadd.f32 %v1754_v47, %v1709_v10  ;;  %v1836_v5 = vadd.f32 %v1754_v47, %v1710_v57 }
 0x2a4   :  { %1871 = vst [vmem:[#allocation2 + $0x20] sm:$0xff] %v1835_v0  ;;  %1872 = vst.msk [vmem:[#allocation2 + $0x28] sm:$0xff] %vm1218_vm1, %v1836_v5 }
 0x2a5   :  { %v1638_v11 = vpop.permute.xlu1 %1637  ;;  %v1769_v38 = vpop.permute.xlu0 %1768 }
 0x2a6   :  { %v1713_v30 = vmul.f32 %v3393_v53, %v1638_v11  ;;  %v1714_v22 = vmul.f32 %v3396_v58, %v1638_v11 }
 0x2a9   :  { %v1643_v32 = vpop.permute.xlu1 %1642 }
 0x2aa   :  { %v1715_v37 = vmul.f32 %v3399_v61, %v1643_v32  ;;  %v1716_v24 = vmul.f32 %v3403_v62, %v1643_v32 }
 0x2ac   :  { %v1841_v1 = vadd.f32 %v1769_v38, %v1715_v37  ;;  %v1842_v17 = vadd.f32 %v1769_v38, %v1716_v24 }
 0x2ad   :  { %v1779_v35 = vpop.permute.xlu0 %1778  ;;  %v1764_v39 = vpop.permute.xlu1 %1763 }
 0x2ae   :  { %1877 = vst [vmem:[#allocation2 + $0x50] sm:$0xff] %v1841_v1  ;;  %1878 = vst.msk [vmem:[#allocation2 + $0x58] sm:$0xff] %vm1218_vm1, %v1842_v17  ;;  %v1839_v29 = vadd.f32 %v1764_v39, %v1713_v30  ;;  %v1840_v6 = vadd.f32 %v1764_v39, %v1714_v22  ;;  %v3840_v1 = vld [vmem:[#allocation9_spill] sm:$0xff] }
 0x2b0   :  { %1875 = vst [vmem:[#allocation2 + $0x40] sm:$0xff] %v1839_v29  ;;  %1876 = vst.msk [vmem:[#allocation2 + $0x48] sm:$0xff] %vm1218_vm1, %v1840_v6 }
 0x2b1   :  { %v1663_v28 = vpop.permute.xlu0 %1662  ;;  %v1648_v61 = vpop.permute.xlu1 %1647 }
 0x2b2   :  { %v1723_v62 = vmul.f32 %v3447_v55, %v1663_v28  ;;  %v1724_v53 = vmul.f32 %v3451_v59, %v1663_v28  ;;  %v1717_v40 = vmul.f32 %v3417_v12, %v1648_v61  ;;  %v1718_v48 = vmul.f32 %v3420_v16, %v1648_v61  ;;  %v3842_v28 = vld [vmem:[#allocation6_spill] sm:$0xff] }
 0x2b5   :  { %v1789_v51 = vpop.permute.xlu0 %1788  ;;  %v1653_v58 = vpop.permute.xlu1 %1652 }
 0x2b6   :  { %v1849_v63 = vadd.f32 %v1789_v51, %v1723_v62  ;;  %v1850_v41 = vadd.f32 %v1789_v51, %v1724_v53  ;;  %v1719_v33 = vmul.f32 %v3423_v21, %v1653_v58  ;;  %v1720_v3 = vmul.f32 %v3427_v25, %v1653_v58  ;;  %v3843_v58 = vld [vmem:[#allocation7_spill] sm:$0xff] }
 0x2b8   :  { %1885 = vst [vmem:[#allocation2 + $0x90] sm:$0xff] %v1849_v63  ;;  %1886 = vst.msk [vmem:[#allocation2 + $0x98] sm:$0xff] %vm1218_vm1, %v1850_v41  ;;  %v1845_v20 = vadd.f32 %v1779_v35, %v1719_v33  ;;  %v1846_v43 = vadd.f32 %v1779_v35, %v1720_v3  ;;  %v3844_v41 = vld [vmem:[#allocation8_spill] sm:$0xff] }
 0x2b9   :  { %v1673_v55 = vpop.permute.xlu0 %1672  ;;  %v1774_v4 = vpop.permute.xlu1 %1773 }
 0x2ba   :  { %1881 = vst [vmem:[#allocation2 + $0x70] sm:$0xff] %v1845_v20  ;;  %1882 = vst.msk [vmem:[#allocation2 + $0x78] sm:$0xff] %vm1218_vm1, %v1846_v43  ;;  %v1843_v59 = vadd.f32 %v1774_v4, %v1717_v40  ;;  %v1844_v19 = vadd.f32 %v1774_v4, %v1718_v48  ;;  %v1727_v21 = vmul.f32 %v3471_v18, %v1673_v55 }
 0x2bb   :  { %v1728_v25 = vmul.f32 %v3475_v23, %v1673_v55 }
 0x2bc   :  { %1879 = vst [vmem:[#allocation2 + $0x60] sm:$0xff] %v1843_v59  ;;  %1880 = vst.msk [vmem:[#allocation2 + $0x68] sm:$0xff] %vm1218_vm1, %v1844_v19 }
 0x2bd   :  { %v1799_v12 = vpop.permute.xlu0 %1798  ;;  %v1658_v16 = vpop.permute.xlu1 %1657 }
 0x2be   :  { %v1853_v56 = vadd.f32 %v1799_v12, %v1727_v21  ;;  %v1854_v49 = vadd.f32 %v1799_v12, %v1728_v25  ;;  %v1721_v34 = vmul.f32 %v3441_v45, %v1658_v16  ;;  %v1722_v27 = vmul.f32 %v3444_v50, %v1658_v16 }
 0x2c0   :  { %1889 = vst [vmem:[#allocation2 + $0xb0] sm:$0xff] %v1853_v56  ;;  %1890 = vst.msk [vmem:[#allocation2 + $0xb8] sm:$0xff] %vm1218_vm1, %v1854_v49 }
 0x2c1   :  { %v1683_v54 = vpop.permute.xlu0 %1682  ;;  %v1784_v44 = vpop.permute.xlu1 %1783 }
 0x2c2   :  { %v1847_v13 = vadd.f32 %v1784_v44, %v1721_v34  ;;  %v1848_v18 = vadd.f32 %v1784_v44, %v1722_v27  ;;  %v1731_v23 = vmul.f32 %v3495_v60, %v1683_v54  ;;  %v1732_v8 = vmul.f32 %v3499_v42, %v1683_v54 }
 0x2c4   :  { %1883 = vst [vmem:[#allocation2 + $0x80] sm:$0xff] %v1847_v13  ;;  %1884 = vst.msk [vmem:[#allocation2 + $0x88] sm:$0xff] %vm1218_vm1, %v1848_v18 }
 0x2c5   :  { %v1809_v15 = vpop.permute.xlu0 %1808  ;;  %v1668_v10 = vpop.permute.xlu1 %1667 }
 0x2c6   :  { %v1857_v57 = vadd.f32 %v1809_v15, %v1731_v23  ;;  %v1858_v26 = vadd.f32 %v1809_v15, %v1732_v8  ;;  %v1725_v45 = vmul.f32 %v3465_v7, %v1668_v10  ;;  %v1726_v50 = vmul.f32 %v3468_v14, %v1668_v10 }
 0x2c8   :  { %1893 = vst [vmem:[#allocation2 + $0xd0] sm:$0xff] %v1857_v57  ;;  %1894 = vst.msk [vmem:[#allocation2 + $0xd8] sm:$0xff] %vm1218_vm1, %v1858_v26 }
 0x2c9   :  { %v1693_v2 = vpop.permute.xlu0 %1692  ;;  %v1794_v47 = vpop.permute.xlu1 %1793 }
 0x2ca   :  { %v1851_v0 = vadd.f32 %v1794_v47, %v1725_v45  ;;  %v1852_v60 = vadd.f32 %v1794_v47, %v1726_v50  ;;  %v1735_v42 = vmul.f32 %v3519_v36, %v1693_v2  ;;  %v1736_v5 = vmul.f32 %v3523_v31, %v1693_v2 }
 0x2cc   :  { %1887 = vst [vmem:[#allocation2 + $0xa0] sm:$0xff] %v1851_v0  ;;  %1888 = vst.msk [vmem:[#allocation2 + $0xa8] sm:$0xff] %vm1218_vm1, %v1852_v60 }
 0x2cd   :  { %v1819_v11 = vpop.permute.xlu0 %1818  ;;  %v1678_v38 = vpop.permute.xlu1 %1677 }
 0x2ce   :  { %v1861_v32 = vadd.f32 %v1819_v11, %v1735_v42  ;;  %v1862_v37 = vadd.f32 %v1819_v11, %v1736_v5  ;;  %v1729_v7 = vmul.f32 %v3489_v46, %v1678_v38  ;;  %v1730_v14 = vmul.f32 %v3492_v52, %v1678_v38  ;;  %v3841_v46 = vld [vmem:[#allocation5_spill] sm:$0xff] }
 0x2d0   :  { %1897 = vst [vmem:[#allocation2 + $0xf0] sm:$0xff] %v1861_v32  ;;  %1898 = vst.msk [vmem:[#allocation2 + $0xf8] sm:$0xff] %vm1218_vm1, %v1862_v37 }
 0x2d1   :  { %v1703_v24 = vpop.permute.xlu0 %1702  ;;  %v1804_v30 = vpop.permute.xlu1 %1803 }
 0x2d2   :  { %v1855_v22 = vadd.f32 %v1804_v30, %v1729_v7  ;;  %v1856_v36 = vadd.f32 %v1804_v30, %v1730_v14  ;;  %v1739_v31 = vmul.f32 %v3543_v9, %v1703_v24  ;;  %v1740_v17 = vmul.f32 %v3840_v1, %v1703_v24 }
 0x2d4   :  { %1891 = vst [vmem:[#allocation2 + $0xc0] sm:$0xff] %v1855_v22  ;;  %1892 = vst.msk [vmem:[#allocation2 + $0xc8] sm:$0xff] %vm1218_vm1, %v1856_v36 }
 0x2d5   :  { %v1829_v35 = vpop.permute.xlu0 %1828  ;;  %v1688_v39 = vpop.permute.xlu1 %1687 }
 0x2d6   :  { %v1865_v29 = vadd.f32 %v1829_v35, %v1739_v31  ;;  %v1866_v6 = vadd.f32 %v1829_v35, %v1740_v17  ;;  %v1733_v52 = vmul.f32 %v3841_v46, %v1688_v39  ;;  %v1734_v61 = vmul.f32 %v3842_v28, %v1688_v39 }
 0x2d8   :  { %1901 = vst [vmem:[#allocation2 + $0x110] sm:$0xff] %v1865_v29  ;;  %1902 = vst.msk [vmem:[#allocation2 + $0x118] sm:$0xff] %vm1218_vm1, %v1866_v6 }
 0x2d9   :  { %v1814_v62 = vpop.permute.xlu1 %1813 }
 0x2da   :  { %v1859_v53 = vadd.f32 %v1814_v62, %v1733_v52  ;;  %v1860_v51 = vadd.f32 %v1814_v62, %v1734_v61 }
 0x2dc   :  { %1895 = vst [vmem:[#allocation2 + $0xe0] sm:$0xff] %v1859_v53  ;;  %1896 = vst.msk [vmem:[#allocation2 + $0xe8] sm:$0xff] %vm1218_vm1, %v1860_v51 }
 0x2dd   :  { %v1698_v9 = vpop.permute.xlu1 %1697 }
 0x2de   :  { %v1737_v63 = vmul.f32 %v3843_v58, %v1698_v9  ;;  %v1738_v33 = vmul.f32 %v3844_v41, %v1698_v9 }
 0x2e1   :  { %v1824_v3 = vpop.permute.xlu1 %1823 }
 0x2e2   :  { %v1863_v40 = vadd.f32 %v1824_v3, %v1737_v63  ;;  %v1864_v48 = vadd.f32 %v1824_v3, %v1738_v33 }
 0x2e4   :  { %1899 = vst [vmem:[#allocation2 + $0x100] sm:$0xff] %v1863_v40  ;;  %1900 = vst.msk [vmem:[#allocation2 + $0x108] sm:$0xff] %vm1218_vm1, %v1864_v48 }
 0x2e5   :  { %2089 = shalt.err (!%p2086_p4)
}
 0x2e6   :  { %s2090_s23 = scalar_lea.hbm %s3829_s5, 4608 }
 0x2e7   :  { %p2091_p5 = scmp.ne.s32.totalorder %s3829_s5, %s2090_s23  ;;  %p2094_p6 = scmp.lt.u32.totalorder %s2090_s23, %s3829_s5 }
 0x2e9   :  { %p2096_p7 = pnand %p2094_p6, %p2091_p5 }
 0x2eb   :  { %2099 = shalt.err (!%p2096_p7)
}
 0x2ec   :  { %s2104_s2 = smov 256   ;;  %s2105_s28 = smov 16  }
 0x2ed   :  { %1914 = dma.vmem_to_hbm [thread:$0]  %s1909_s4, 4608, %s3829_s5, [#allocation3], %s2104_s2, %s2104_s2, %s2105_s28  }
 0x2ee   :  { %2100 = dma.done.wait [#allocation3], 4608  }
 0x2ef   :  { %2101 = vsyncadd [#allocation3], 4294962688 }
 0x2f0   :  { %1918 = vsyncpa [#allocation3], 1 }

</bundles_post_ra>
